<compile_context>
chip_gen: v7x
topology: tpu7x:2x2x1
jax: 0.10.0
libtpu: 0.0.40
codegen_flags: <defaults>
</compile_context>

<pallas_src>
import numpy as np
import jax
import jax.numpy as jnp
from jax import lax
from jax.experimental import pallas as pl
from jax.experimental.pallas import tpu as pltpu

# ----------------------------------------------------------------------------
# Structural constants (mirror FairCNN.__init__ with data_size = [(4, 16), n])
# ----------------------------------------------------------------------------
C_IN, DX = 4, 16              # input channels, spatial size
K1 = K2 = 5                   # conv kernel sizes
C1, C2 = 6, 16                # conv1 / conv2 output channels
N_CLASSES = 3
NPAD = 128                    # lane-dense padding for the FC head

OH1 = DX - K1 + 1             # 12   conv1 output spatial
POOL1 = OH1 // 2              # 6    after 2x2 max-pool
OH2 = POOL1 - K2 + 1          # 2    conv2 output spatial
POOL2 = OH2 // 2              # 1    after 2x2 max-pool
FLAT = C2 * POOL2 * POOL2     # 16   flattened feature size (== demo.shape[1])
LANES_IN = 2 * DX * C_IN      # 128  lanes of the phase-folded input rows

assert OH1 % 2 == 0 and OH2 == 2 and DX % 2 == 0
assert POOL1 * C1 <= 128 and LANES_IN <= 128 * 2


# ----------------------------------------------------------------------------
# In-kernel helpers
# ----------------------------------------------------------------------------
def _elu(y):
    """ELU(alpha=1); negative branch exp(min(y,0))-1 runs on the EUP slot."""
    return jnp.where(y > 0.0, y, jnp.exp(jnp.minimum(y, 0.0)) - 1.0)


# ----------------------------------------------------------------------------
# The fused kernel: one grid step == one image, everything stays in VMEM/vregs
# ----------------------------------------------------------------------------
def _fair_cnn_kernel(x_ref, w1_ref, b1_ref, w2_ref, b2_ref,
                     fw1_ref, fb1_ref, fw2_ref, fb2_ref, fw3_ref, fb3_ref,
                     o_ref):
    f32, bf16 = jnp.float32, jnp.bfloat16

    # ---- conv1 (5x5, C_IN->6) + 2x2 max-pool: 4 pooling-phase Toeplitz matmuls.
    # x_ref is (DX/2, 2*W*C): row hh holds image rows 2*hh and 2*hh+1 side by
    # side in lanes; the Toeplitz weight selects the right half per tap, so the
    # LHS of every matmul is a contiguous row slice (no gather, no im2col).
    pool1 = None
    for p in range(2):                       # output-row (oh) pooling phase
        for q in range(2):                   # output-col (ow) pooling phase
            acc = None
            for i in range(K1):              # kernel-row tap
                lhs = x_ref[pl.ds((p + i) // 2, POOL1), :].astype(bf16)   # (6,128)
                part = jnp.dot(lhs, w1_ref[p, q, i], preferred_element_type=f32)
                acc = part if acc is None else acc + part
            pool1 = acc if pool1 is None else jnp.maximum(pool1, acc)
    # max-pool commutes with the monotone (+bias, ELU), so pooling pre-activation
    # is exact:  pool(ELU(conv + b)) == ELU(pool(conv) + b)
    p1 = _elu(pool1 + b1_ref[...])           # (6, 36) f32, lanes = (w, c1)

    # ---- conv2 (5x5, 6->16) + 2x2 max-pool (pre-pool spatial is only 2x2).
    pool2 = None
    for q in range(2):                       # the two output columns (ow2)
        acc = None
        for i in range(K2):
            lhs = p1[i:i + 2, :].astype(bf16)                     # (2, 36)
            part = jnp.dot(lhs, w2_ref[q, i], preferred_element_type=f32)
            acc = part if acc is None else acc + part
        pool2 = acc if pool2 is None else jnp.maximum(pool2, acc)
    pool2 = jnp.maximum(pool2[0:1, :], pool2[1:2, :])             # pool the 2 rows
    feat = _elu(pool2 + b2_ref[...])         # (1, 16) == torch.flatten(x, 1)

    # ---- FC head: fc1+ELU -> fc2+ELU -> fc3 -> masked softmax (lane-dense 128)
    h = _elu(jnp.dot(feat.astype(bf16), fw1_ref[...],
                     preferred_element_type=f32) + fb1_ref[...])
    h = _elu(jnp.dot(h.astype(bf16), fw2_ref[...],
                     preferred_element_type=f32) + fb2_ref[...])
    logits = jnp.dot(h.astype(bf16), fw3_ref[...],
                     preferred_element_type=f32) + fb3_ref[...]

    col = lax.broadcasted_iota(jnp.int32, logits.shape, 1)
    logits = jnp.where(col < N_CLASSES, logits, -1e30)            # mask padding
    m = jnp.max(logits, axis=-1, keepdims=True)
    e = jnp.exp(logits - m)
    d = jnp.sum(e, axis=-1, keepdims=True)
    r = pl.reciprocal(d, approx=True)
    r = r * (2.0 - d * r)                                         # one Newton step
    o_ref[...] = (e * r).astype(o_ref.dtype)


# ----------------------------------------------------------------------------
# Wrapper: one pallas_call for the whole forward pass
# ----------------------------------------------------------------------------
def fair_cnn_forward(x_nchw, params):
    """x_nchw: (B, C, H, W) float32, identical to the PyTorch module input."""
    B = x_nchw.shape[0]
    x = jnp.transpose(x_nchw, (0, 2, 3, 1)).astype(jnp.float32)   # NHWC
    # fold the pooling row-phase into lanes: (B, H, W, C) -> (B, H/2, 2*W*C)
    # (contiguous reshape, no data movement)
    x2 = x.reshape(B, DX // 2, LANES_IN)

    const2 = lambda b: (0, 0)
    in_specs = [
        pl.BlockSpec((None, DX // 2, LANES_IN), lambda b: (b, 0, 0)),   # image
        pl.BlockSpec(params["w1"].shape, lambda b: (0, 0, 0, 0, 0)),    # conv1 Toeplitz
        pl.BlockSpec(params["b1"].shape, const2),
        pl.BlockSpec(params["w2"].shape, lambda b: (0, 0, 0, 0)),       # conv2 Toeplitz
        pl.BlockSpec(params["b2"].shape, const2),
        pl.BlockSpec(params["fc1_w"].shape, const2),
        pl.BlockSpec(params["fc1_b"].shape, const2),
        pl.BlockSpec(params["fc2_w"].shape, const2),
        pl.BlockSpec(params["fc2_b"].shape, const2),
        pl.BlockSpec(params["fc3_w"].shape, const2),
        pl.BlockSpec(params["fc3_b"].shape, const2),
    ]
    out_spec = pl.BlockSpec((None, 1, NPAD), lambda b: (b, 0, 0))

    flops = B * 2 * (4 * K1 * POOL1 * LANES_IN * (POOL1 * C1)
                     + 2 * K2 * 2 * (POOL1 * C1) * C2
                     + FLAT * NPAD + 2 * NPAD * NPAD)
    weight_bytes = 2 * sum(int(np.prod(params[k].shape))
                           for k in ("w1", "w2", "fc1_w", "fc2_w", "fc3_w"))
    ce = pl.CostEstimate(
        flops=flops,
        transcendentals=B * (POOL1 * POOL1 * C1 + C2 + 120 + 84 + NPAD),
        bytes_accessed=weight_bytes + B * (DX * DX * C_IN + NPAD) * 4)

    probs = pl.pallas_call(
        _fair_cnn_kernel,
        out_shape=jax.ShapeDtypeStruct((B, 1, NPAD), jnp.float32),
        grid_spec=pltpu.PrefetchScalarGridSpec(
            num_scalar_prefetch=0,
            grid=(B,),
            in_specs=in_specs,
            out_specs=out_spec,
        ),
        compiler_params=pltpu.CompilerParams(
            dimension_semantics=("parallel",)),   # megacore sharding on v7x
        cost_estimate=ce,
    )(x2, params["w1"], params["b1"], params["w2"], params["b2"],
      params["fc1_w"], params["fc1_b"], params["fc2_w"], params["fc2_b"],
      params["fc3_w"], params["fc3_b"])

    return probs[:, 0, :N_CLASSES]                 # (B, 3), rows sum to 1


# ----------------------------------------------------------------------------
# Parameter construction: torch-equivalent init + pre-expanded Toeplitz weights
# ----------------------------------------------------------------------------
def _pack_params(raw):
    """Expand torch-layout weights into the kernel's matmul-ready (bf16) form."""
    w1, b1 = raw["conv1_w"], raw["conv1_b"]
    # W1[p, q, i, ph*W*C + w*C + c, s*C1 + cout] = w1[cout, c, i, w - (2s+q)]
    W1 = np.zeros((2, 2, K1, LANES_IN, POOL1 * C1), np.float32)
    for p in range(2):
        for q in range(2):
            for i in range(K1):
                ph = (p + i) % 2
                for s in range(POOL1):
                    for j in range(K1):
                        w = 2 * s + q + j
                        for c in range(C_IN):
                            W1[p, q, i, ph * DX * C_IN + w * C_IN + c,
                               s * C1:(s + 1) * C1] = w1[:, c, i, j]
    b1row = np.tile(b1, POOL1).reshape(1, POOL1 * C1)

    w2, b2 = raw["conv2_w"], raw["conv2_b"]
    # W2[q, i, s*C1 + c1, cout] = w2[cout, c1, i, s - q]
    W2 = np.zeros((2, K2, POOL1 * C1, C2), np.float32)
    for q in range(2):
        for i in range(K2):
            for j in range(K2):
                s = q + j
                for c1 in range(C1):
                    W2[q, i, s * C1 + c1, :] = w2[:, c1, i, j]
    b2row = b2.reshape(1, C2)

    def pad2(a, rows, cols):
        out = np.zeros((rows, cols), np.float32)
        out[:a.shape[0], :a.shape[1]] = a
        return out

    fc1_m = pad2(raw["fc1_w"].T, FLAT, NPAD)
    fc2_m = pad2(raw["fc2_w"].T, NPAD, NPAD)
    fc3_m = pad2(raw["fc3_w"].T, NPAD, NPAD)
    fc1_b = pad2(raw["fc1_b"].reshape(1, -1), 1, NPAD)
    fc2_b = pad2(raw["fc2_b"].reshape(1, -1), 1, NPAD)
    fc3_b = pad2(raw["fc3_b"].reshape(1, -1), 1, NPAD)

    bf = jnp.bfloat16
    return dict(
        w1=jnp.asarray(W1, bf), b1=jnp.asarray(b1row, jnp.float32),
        w2=jnp.asarray(W2, bf), b2=jnp.asarray(b2row, jnp.float32),
        fc1_w=jnp.asarray(fc1_m, bf), fc1_b=jnp.asarray(fc1_b, jnp.float32),
        fc2_w=jnp.asarray(fc2_m, bf), fc2_b=jnp.asarray(fc2_b, jnp.float32),
        fc3_w=jnp.asarray(fc3_m, bf), fc3_b=jnp.asarray(fc3_b, jnp.float32),
    )


def init_params(key, channel=C_IN, d_x=DX):
    assert channel == C_IN and d_x == DX, "Toeplitz tables are built for (4, 16)"
    ks = jax.random.split(key, 10)

    def uni(k, shape, limit):
        return np.asarray(jax.random.uniform(k, shape, jnp.float32, -limit, limit))

    # torch Conv2d default init: U(+-1/sqrt(fan_in)) for weight and bias
    c1_bound = (1.0 / (C_IN * K1 * K1)) ** 0.5
    c2_bound = (1.0 / (C1 * K2 * K2)) ** 0.5
    w1 = uni(ks[0], (C1, C_IN, K1, K1), c1_bound)
    b1 = uni(ks[1], (C1,), c1_bound)
    w2 = uni(ks[2], (C2, C1, K2, K2), c2_bound)
    b2 = uni(ks[3], (C2,), c2_bound)

    def xavier(k, fout, fin):
        return uni(k, (fout, fin), (6.0 / (fin + fout)) ** 0.5)   # torch layout

    def linear_bias(k, fout, fin):
        return uni(k, (fout,), (1.0 / fin) ** 0.5)                # torch Linear default

    fc1_w, fc1_b = xavier(ks[4], 120, FLAT), linear_bias(ks[5], 120, FLAT)
    fc2_w, fc2_b = xavier(ks[6], 84, 120), linear_bias(ks[7], 84, 120)
    fc3_w, fc3_b = xavier(ks[8], N_CLASSES, 84), linear_bias(ks[9], N_CLASSES, 84)

    raw = dict(conv1_w=w1, conv1_b=b1, conv2_w=w2, conv2_b=b2,
               fc1_w=fc1_w, fc1_b=fc1_b, fc2_w=fc2_w, fc2_b=fc2_b,
               fc3_w=fc3_w, fc3_b=fc3_b,
               # dual_y exists in the torch module but is unused in forward()
               dual_y=np.full((N_CLASSES,), 1.0 / N_CLASSES, np.float32))
    return _pack_params(raw), raw


# ----------------------------------------------------------------------------
# Pure-JAX reference (f32, torch-layout weights) for a loose correctness check
# ----------------------------------------------------------------------------
def _elu_ref(y):
    return jnp.where(y > 0.0, y, jnp.expm1(jnp.minimum(y, 0.0)))


def reference_forward(x_nchw, raw):
    dn = ("NCHW", "OIHW", "NCHW")

    def maxpool2(y):
        b, c, h, w = y.shape
        return y.reshape(b, c, h // 2, 2, w // 2, 2).max(axis=(3, 5))

    y = lax.conv_general_dilated(x_nchw, jnp.asarray(raw["conv1_w"]),
                                 (1, 1), "VALID", dimension_numbers=dn)
    y = maxpool2(_elu_ref(y + jnp.asarray(raw["conv1_b"]).reshape(1, -1, 1, 1)))
    y = lax.conv_general_dilated(y, jnp.asarray(raw["conv2_w"]),
                                 (1, 1), "VALID", dimension_numbers=dn)
    y = maxpool2(_elu_ref(y + jnp.asarray(raw["conv2_b"]).reshape(1, -1, 1, 1)))
    f = y.reshape(y.shape[0], -1)
    h = _elu_ref(f @ jnp.asarray(raw["fc1_w"]).T + jnp.asarray(raw["fc1_b"]))
    h = _elu_ref(h @ jnp.asarray(raw["fc2_w"]).T + jnp.asarray(raw["fc2_b"]))
    logits = h @ jnp.asarray(raw["fc3_w"]).T + jnp.asarray(raw["fc3_b"])
    return jax.nn.softmax(logits, axis=-1)


# ----------------------------------------------------------------------------
if __name__ == "__main__":
    B = 2
    key = jax.random.PRNGKey(0)
    k_x, k_p = jax.random.split(key)

    x = jax.random.normal(k_x, (B, C_IN, DX, DX), dtype=jnp.float32)
    params, raw = init_params(k_p)

    fwd = jax.jit(fair_cnn_forward)
    out = jax.block_until_ready(fwd(x, params))

    assert out.shape == (B, N_CLASSES), out.shape
    assert bool(jnp.all(jnp.isfinite(out)))
    row_sums = jnp.sum(out, axis=1)
    assert bool(jnp.all(jnp.abs(row_sums - 1.0) < 1e-4)), row_sums

    # loose check vs an f32 XLA reference (kernel matmuls are bf16)
    ref = reference_forward(x, raw)
    max_err = float(jnp.max(jnp.abs(out - ref)))
    assert max_err < 5e-2, max_err

    print("KERNEL_OK")
</pallas_src>

<mosaic_0001>
module attributes {stable_mosaic.version = 11 : i64} {
  func.func @_fair_cnn_kernel(%arg0: i32, %arg1: memref<1x8x128xf32, #tpu.memory_space<vmem>>, %arg2: memref<2x2x5x128x36xbf16, #tpu.memory_space<vmem>>, %arg3: memref<1x36xf32, #tpu.memory_space<vmem>>, %arg4: memref<2x5x36x16xbf16, #tpu.memory_space<vmem>>, %arg5: memref<1x16xf32, #tpu.memory_space<vmem>>, %arg6: memref<16x128xbf16, #tpu.memory_space<vmem>>, %arg7: memref<1x128xf32, #tpu.memory_space<vmem>>, %arg8: memref<128x128xbf16, #tpu.memory_space<vmem>>, %arg9: memref<1x128xf32, #tpu.memory_space<vmem>>, %arg10: memref<128x128xbf16, #tpu.memory_space<vmem>>, %arg11: memref<1x128xf32, #tpu.memory_space<vmem>>, %arg12: memref<1x1x128xf32, #tpu.memory_space<vmem>>) attributes {dimension_semantics = [#tpu.dimension_semantics<parallel>], iteration_bounds = array<i64: 2>, scalar_prefetch = 0 : i64, scratch_operands = 0 : i64, tpu.core_type = #tpu.core_type<tc>, window_params = [{transform_indices = @transform_0, window_bounds = array<i64: 1, 8, 128>}, {pipeline_mode = #tpu.pipeline_mode<synchronous>, transform_indices = @transform_1, window_bounds = array<i64: 2, 2, 5, 128, 36>}, {pipeline_mode = #tpu.pipeline_mode<synchronous>, transform_indices = @transform_2, window_bounds = array<i64: 1, 36>}, {pipeline_mode = #tpu.pipeline_mode<synchronous>, transform_indices = @transform_3, window_bounds = array<i64: 2, 5, 36, 16>}, {pipeline_mode = #tpu.pipeline_mode<synchronous>, transform_indices = @transform_4, window_bounds = array<i64: 1, 16>}, {pipeline_mode = #tpu.pipeline_mode<synchronous>, transform_indices = @transform_5, window_bounds = array<i64: 16, 128>}, {pipeline_mode = #tpu.pipeline_mode<synchronous>, transform_indices = @transform_6, window_bounds = array<i64: 1, 128>}, {pipeline_mode = #tpu.pipeline_mode<synchronous>, transform_indices = @transform_7, window_bounds = array<i64: 128, 128>}, {pipeline_mode = #tpu.pipeline_mode<synchronous>, transform_indices = @transform_8, window_bounds = array<i64: 1, 128>}, {pipeline_mode = #tpu.pipeline_mode<synchronous>, transform_indices = @transform_9, window_bounds = array<i64: 128, 128>}, {pipeline_mode = #tpu.pipeline_mode<synchronous>, transform_indices = @transform_10, window_bounds = array<i64: 1, 128>}, {transform_indices = @transform_11, window_bounds = array<i64: 1, 1, 128>}]} {
    %c0 = arith.constant 0 : index
    %c0_0 = arith.constant 0 : index
    %c0_1 = arith.constant 0 : index
    %0 = vector.load %arg1[%c0, %c0_0, %c0_1] : memref<1x8x128xf32, #tpu.memory_space<vmem>>, vector<1x6x128xf32>
    %1 = vector.shape_cast %0 : vector<1x6x128xf32> to vector<6x128xf32>
    %2 = arith.truncf %1 : vector<6x128xf32> to vector<6x128xbf16>
    %c0_2 = arith.constant 0 : index
    %c0_3 = arith.constant 0 : index
    %c0_4 = arith.constant 0 : index
    %c0_5 = arith.constant 0 : index
    %c0_6 = arith.constant 0 : index
    %3 = vector.load %arg2[%c0_2, %c0_3, %c0_4, %c0_5, %c0_6] : memref<2x2x5x128x36xbf16, #tpu.memory_space<vmem>>, vector<1x1x1x128x36xbf16>
    %4 = vector.shape_cast %3 : vector<1x1x1x128x36xbf16> to vector<128x36xbf16>
    %cst = arith.constant dense<0.000000e+00> : vector<6x36xf32>
    %5 = tpu.matmul %2, %4, %cst {dimension_numbers = #tpu.dot_dimension_numbers<[1], [0], [0], [1], [0, 0, 1, 1], [], []>} : vector<6x128xbf16>, vector<128x36xbf16>, vector<6x36xf32> -> vector<6x36xf32>
    %c0_7 = arith.constant 0 : index
    %c0_8 = arith.constant 0 : index
    %c0_9 = arith.constant 0 : index
    %6 = vector.load %arg1[%c0_7, %c0_8, %c0_9] : memref<1x8x128xf32, #tpu.memory_space<vmem>>, vector<1x6x128xf32>
    %7 = vector.shape_cast %6 : vector<1x6x128xf32> to vector<6x128xf32>
    %8 = arith.truncf %7 : vector<6x128xf32> to vector<6x128xbf16>
    %c0_10 = arith.constant 0 : index
    %c0_11 = arith.constant 0 : index
    %c1 = arith.constant 1 : index
    %c0_12 = arith.constant 0 : index
    %c0_13 = arith.constant 0 : index
    %9 = vector.load %arg2[%c0_10, %c0_11, %c1, %c0_12, %c0_13] : memref<2x2x5x128x36xbf16, #tpu.memory_space<vmem>>, vector<1x1x1x128x36xbf16>
    %10 = vector.shape_cast %9 : vector<1x1x1x128x36xbf16> to vector<128x36xbf16>
    %cst_14 = arith.constant dense<0.000000e+00> : vector<6x36xf32>
    %11 = tpu.matmul %8, %10, %cst_14 {dimension_numbers = #tpu.dot_dimension_numbers<[1], [0], [0], [1], [0, 0, 1, 1], [], []>} : vector<6x128xbf16>, vector<128x36xbf16>, vector<6x36xf32> -> vector<6x36xf32>
    %12 = arith.addf %5, %11 : vector<6x36xf32>
    %c0_15 = arith.constant 0 : index
    %c1_16 = arith.constant 1 : index
    %c0_17 = arith.constant 0 : index
    %13 = vector.load %arg1[%c0_15, %c1_16, %c0_17] : memref<1x8x128xf32, #tpu.memory_space<vmem>>, vector<1x6x128xf32>
    %14 = vector.shape_cast %13 : vector<1x6x128xf32> to vector<6x128xf32>
    %15 = arith.truncf %14 : vector<6x128xf32> to vector<6x128xbf16>
    %c0_18 = arith.constant 0 : index
    %c0_19 = arith.constant 0 : index
    %c2 = arith.constant 2 : index
    %c0_20 = arith.constant 0 : index
    %c0_21 = arith.constant 0 : index
    %16 = vector.load %arg2[%c0_18, %c0_19, %c2, %c0_20, %c0_21] : memref<2x2x5x128x36xbf16, #tpu.memory_space<vmem>>, vector<1x1x1x128x36xbf16>
    %17 = vector.shape_cast %16 : vector<1x1x1x128x36xbf16> to vector<128x36xbf16>
    %cst_22 = arith.constant dense<0.000000e+00> : vector<6x36xf32>
    %18 = tpu.matmul %15, %17, %cst_22 {dimension_numbers = #tpu.dot_dimension_numbers<[1], [0], [0], [1], [0, 0, 1, 1], [], []>} : vector<6x128xbf16>, vector<128x36xbf16>, vector<6x36xf32> -> vector<6x36xf32>
    %19 = arith.addf %12, %18 : vector<6x36xf32>
    %c0_23 = arith.constant 0 : index
    %c1_24 = arith.constant 1 : index
    %c0_25 = arith.constant 0 : index
    %20 = vector.load %arg1[%c0_23, %c1_24, %c0_25] : memref<1x8x128xf32, #tpu.memory_space<vmem>>, vector<1x6x128xf32>
    %21 = vector.shape_cast %20 : vector<1x6x128xf32> to vector<6x128xf32>
    %22 = arith.truncf %21 : vector<6x128xf32> to vector<6x128xbf16>
    %c0_26 = arith.constant 0 : index
    %c0_27 = arith.constant 0 : index
    %c3 = arith.constant 3 : index
    %c0_28 = arith.constant 0 : index
    %c0_29 = arith.constant 0 : index
    %23 = vector.load %arg2[%c0_26, %c0_27, %c3, %c0_28, %c0_29] : memref<2x2x5x128x36xbf16, #tpu.memory_space<vmem>>, vector<1x1x1x128x36xbf16>
    %24 = vector.shape_cast %23 : vector<1x1x1x128x36xbf16> to vector<128x36xbf16>
    %cst_30 = arith.constant dense<0.000000e+00> : vector<6x36xf32>
    %25 = tpu.matmul %22, %24, %cst_30 {dimension_numbers = #tpu.dot_dimension_numbers<[1], [0], [0], [1], [0, 0, 1, 1], [], []>} : vector<6x128xbf16>, vector<128x36xbf16>, vector<6x36xf32> -> vector<6x36xf32>
    %26 = arith.addf %19, %25 : vector<6x36xf32>
    %c0_31 = arith.constant 0 : index
    %c2_32 = arith.constant 2 : index
    %c0_33 = arith.constant 0 : index
    %27 = vector.load %arg1[%c0_31, %c2_32, %c0_33] : memref<1x8x128xf32, #tpu.memory_space<vmem>>, vector<1x6x128xf32>
    %28 = vector.shape_cast %27 : vector<1x6x128xf32> to vector<6x128xf32>
    %29 = arith.truncf %28 : vector<6x128xf32> to vector<6x128xbf16>
    %c0_34 = arith.constant 0 : index
    %c0_35 = arith.constant 0 : index
    %c4 = arith.constant 4 : index
    %c0_36 = arith.constant 0 : index
    %c0_37 = arith.constant 0 : index
    %30 = vector.load %arg2[%c0_34, %c0_35, %c4, %c0_36, %c0_37] : memref<2x2x5x128x36xbf16, #tpu.memory_space<vmem>>, vector<1x1x1x128x36xbf16>
    %31 = vector.shape_cast %30 : vector<1x1x1x128x36xbf16> to vector<128x36xbf16>
    %cst_38 = arith.constant dense<0.000000e+00> : vector<6x36xf32>
    %32 = tpu.matmul %29, %31, %cst_38 {dimension_numbers = #tpu.dot_dimension_numbers<[1], [0], [0], [1], [0, 0, 1, 1], [], []>} : vector<6x128xbf16>, vector<128x36xbf16>, vector<6x36xf32> -> vector<6x36xf32>
    %33 = arith.addf %26, %32 : vector<6x36xf32>
    %c0_39 = arith.constant 0 : index
    %c0_40 = arith.constant 0 : index
    %c0_41 = arith.constant 0 : index
    %34 = vector.load %arg1[%c0_39, %c0_40, %c0_41] : memref<1x8x128xf32, #tpu.memory_space<vmem>>, vector<1x6x128xf32>
    %35 = vector.shape_cast %34 : vector<1x6x128xf32> to vector<6x128xf32>
    %36 = arith.truncf %35 : vector<6x128xf32> to vector<6x128xbf16>
    %c0_42 = arith.constant 0 : index
    %c1_43 = arith.constant 1 : index
    %c0_44 = arith.constant 0 : index
    %c0_45 = arith.constant 0 : index
    %c0_46 = arith.constant 0 : index
    %37 = vector.load %arg2[%c0_42, %c1_43, %c0_44, %c0_45, %c0_46] : memref<2x2x5x128x36xbf16, #tpu.memory_space<vmem>>, vector<1x1x1x128x36xbf16>
    %38 = vector.shape_cast %37 : vector<1x1x1x128x36xbf16> to vector<128x36xbf16>
    %cst_47 = arith.constant dense<0.000000e+00> : vector<6x36xf32>
    %39 = tpu.matmul %36, %38, %cst_47 {dimension_numbers = #tpu.dot_dimension_numbers<[1], [0], [0], [1], [0, 0, 1, 1], [], []>} : vector<6x128xbf16>, vector<128x36xbf16>, vector<6x36xf32> -> vector<6x36xf32>
    %c0_48 = arith.constant 0 : index
    %c0_49 = arith.constant 0 : index
    %c0_50 = arith.constant 0 : index
    %40 = vector.load %arg1[%c0_48, %c0_49, %c0_50] : memref<1x8x128xf32, #tpu.memory_space<vmem>>, vector<1x6x128xf32>
    %41 = vector.shape_cast %40 : vector<1x6x128xf32> to vector<6x128xf32>
    %42 = arith.truncf %41 : vector<6x128xf32> to vector<6x128xbf16>
    %c0_51 = arith.constant 0 : index
    %c1_52 = arith.constant 1 : index
    %c1_53 = arith.constant 1 : index
    %c0_54 = arith.constant 0 : index
    %c0_55 = arith.constant 0 : index
    %43 = vector.load %arg2[%c0_51, %c1_52, %c1_53, %c0_54, %c0_55] : memref<2x2x5x128x36xbf16, #tpu.memory_space<vmem>>, vector<1x1x1x128x36xbf16>
    %44 = vector.shape_cast %43 : vector<1x1x1x128x36xbf16> to vector<128x36xbf16>
    %cst_56 = arith.constant dense<0.000000e+00> : vector<6x36xf32>
    %45 = tpu.matmul %42, %44, %cst_56 {dimension_numbers = #tpu.dot_dimension_numbers<[1], [0], [0], [1], [0, 0, 1, 1], [], []>} : vector<6x128xbf16>, vector<128x36xbf16>, vector<6x36xf32> -> vector<6x36xf32>
    %46 = arith.addf %39, %45 : vector<6x36xf32>
    %c0_57 = arith.constant 0 : index
    %c1_58 = arith.constant 1 : index
    %c0_59 = arith.constant 0 : index
    %47 = vector.load %arg1[%c0_57, %c1_58, %c0_59] : memref<1x8x128xf32, #tpu.memory_space<vmem>>, vector<1x6x128xf32>
    %48 = vector.shape_cast %47 : vector<1x6x128xf32> to vector<6x128xf32>
    %49 = arith.truncf %48 : vector<6x128xf32> to vector<6x128xbf16>
    %c0_60 = arith.constant 0 : index
    %c1_61 = arith.constant 1 : index
    %c2_62 = arith.constant 2 : index
    %c0_63 = arith.constant 0 : index
    %c0_64 = arith.constant 0 : index
    %50 = vector.load %arg2[%c0_60, %c1_61, %c2_62, %c0_63, %c0_64] : memref<2x2x5x128x36xbf16, #tpu.memory_space<vmem>>, vector<1x1x1x128x36xbf16>
    %51 = vector.shape_cast %50 : vector<1x1x1x128x36xbf16> to vector<128x36xbf16>
    %cst_65 = arith.constant dense<0.000000e+00> : vector<6x36xf32>
    %52 = tpu.matmul %49, %51, %cst_65 {dimension_numbers = #tpu.dot_dimension_numbers<[1], [0], [0], [1], [0, 0, 1, 1], [], []>} : vector<6x128xbf16>, vector<128x36xbf16>, vector<6x36xf32> -> vector<6x36xf32>
    %53 = arith.addf %46, %52 : vector<6x36xf32>
    %c0_66 = arith.constant 0 : index
    %c1_67 = arith.constant 1 : index
    %c0_68 = arith.constant 0 : index
    %54 = vector.load %arg1[%c0_66, %c1_67, %c0_68] : memref<1x8x128xf32, #tpu.memory_space<vmem>>, vector<1x6x128xf32>
    %55 = vector.shape_cast %54 : vector<1x6x128xf32> to vector<6x128xf32>
    %56 = arith.truncf %55 : vector<6x128xf32> to vector<6x128xbf16>
    %c0_69 = arith.constant 0 : index
    %c1_70 = arith.constant 1 : index
    %c3_71 = arith.constant 3 : index
    %c0_72 = arith.constant 0 : index
    %c0_73 = arith.constant 0 : index
    %57 = vector.load %arg2[%c0_69, %c1_70, %c3_71, %c0_72, %c0_73] : memref<2x2x5x128x36xbf16, #tpu.memory_space<vmem>>, vector<1x1x1x128x36xbf16>
    %58 = vector.shape_cast %57 : vector<1x1x1x128x36xbf16> to vector<128x36xbf16>
    %cst_74 = arith.constant dense<0.000000e+00> : vector<6x36xf32>
    %59 = tpu.matmul %56, %58, %cst_74 {dimension_numbers = #tpu.dot_dimension_numbers<[1], [0], [0], [1], [0, 0, 1, 1], [], []>} : vector<6x128xbf16>, vector<128x36xbf16>, vector<6x36xf32> -> vector<6x36xf32>
    %60 = arith.addf %53, %59 : vector<6x36xf32>
    %c0_75 = arith.constant 0 : index
    %c2_76 = arith.constant 2 : index
    %c0_77 = arith.constant 0 : index
    %61 = vector.load %arg1[%c0_75, %c2_76, %c0_77] : memref<1x8x128xf32, #tpu.memory_space<vmem>>, vector<1x6x128xf32>
    %62 = vector.shape_cast %61 : vector<1x6x128xf32> to vector<6x128xf32>
    %63 = arith.truncf %62 : vector<6x128xf32> to vector<6x128xbf16>
    %c0_78 = arith.constant 0 : index
    %c1_79 = arith.constant 1 : index
    %c4_80 = arith.constant 4 : index
    %c0_81 = arith.constant 0 : index
    %c0_82 = arith.constant 0 : index
    %64 = vector.load %arg2[%c0_78, %c1_79, %c4_80, %c0_81, %c0_82] : memref<2x2x5x128x36xbf16, #tpu.memory_space<vmem>>, vector<1x1x1x128x36xbf16>
    %65 = vector.shape_cast %64 : vector<1x1x1x128x36xbf16> to vector<128x36xbf16>
    %cst_83 = arith.constant dense<0.000000e+00> : vector<6x36xf32>
    %66 = tpu.matmul %63, %65, %cst_83 {dimension_numbers = #tpu.dot_dimension_numbers<[1], [0], [0], [1], [0, 0, 1, 1], [], []>} : vector<6x128xbf16>, vector<128x36xbf16>, vector<6x36xf32> -> vector<6x36xf32>
    %67 = arith.addf %60, %66 : vector<6x36xf32>
    %68 = arith.maximumf %33, %67 : vector<6x36xf32>
    %c0_84 = arith.constant 0 : index
    %c0_85 = arith.constant 0 : index
    %c0_86 = arith.constant 0 : index
    %69 = vector.load %arg1[%c0_84, %c0_85, %c0_86] : memref<1x8x128xf32, #tpu.memory_space<vmem>>, vector<1x6x128xf32>
    %70 = vector.shape_cast %69 : vector<1x6x128xf32> to vector<6x128xf32>
    %71 = arith.truncf %70 : vector<6x128xf32> to vector<6x128xbf16>
    %c1_87 = arith.constant 1 : index
    %c0_88 = arith.constant 0 : index
    %c0_89 = arith.constant 0 : index
    %c0_90 = arith.constant 0 : index
    %c0_91 = arith.constant 0 : index
    %72 = vector.load %arg2[%c1_87, %c0_88, %c0_89, %c0_90, %c0_91] : memref<2x2x5x128x36xbf16, #tpu.memory_space<vmem>>, vector<1x1x1x128x36xbf16>
    %73 = vector.shape_cast %72 : vector<1x1x1x128x36xbf16> to vector<128x36xbf16>
    %cst_92 = arith.constant dense<0.000000e+00> : vector<6x36xf32>
    %74 = tpu.matmul %71, %73, %cst_92 {dimension_numbers = #tpu.dot_dimension_numbers<[1], [0], [0], [1], [0, 0, 1, 1], [], []>} : vector<6x128xbf16>, vector<128x36xbf16>, vector<6x36xf32> -> vector<6x36xf32>
    %c0_93 = arith.constant 0 : index
    %c1_94 = arith.constant 1 : index
    %c0_95 = arith.constant 0 : index
    %75 = vector.load %arg1[%c0_93, %c1_94, %c0_95] : memref<1x8x128xf32, #tpu.memory_space<vmem>>, vector<1x6x128xf32>
    %76 = vector.shape_cast %75 : vector<1x6x128xf32> to vector<6x128xf32>
    %77 = arith.truncf %76 : vector<6x128xf32> to vector<6x128xbf16>
    %c1_96 = arith.constant 1 : index
    %c0_97 = arith.constant 0 : index
    %c1_98 = arith.constant 1 : index
    %c0_99 = arith.constant 0 : index
    %c0_100 = arith.constant 0 : index
    %78 = vector.load %arg2[%c1_96, %c0_97, %c1_98, %c0_99, %c0_100] : memref<2x2x5x128x36xbf16, #tpu.memory_space<vmem>>, vector<1x1x1x128x36xbf16>
    %79 = vector.shape_cast %78 : vector<1x1x1x128x36xbf16> to vector<128x36xbf16>
    %cst_101 = arith.constant dense<0.000000e+00> : vector<6x36xf32>
    %80 = tpu.matmul %77, %79, %cst_101 {dimension_numbers = #tpu.dot_dimension_numbers<[1], [0], [0], [1], [0, 0, 1, 1], [], []>} : vector<6x128xbf16>, vector<128x36xbf16>, vector<6x36xf32> -> vector<6x36xf32>
    %81 = arith.addf %74, %80 : vector<6x36xf32>
    %c0_102 = arith.constant 0 : index
    %c1_103 = arith.constant 1 : index
    %c0_104 = arith.constant 0 : index
    %82 = vector.load %arg1[%c0_102, %c1_103, %c0_104] : memref<1x8x128xf32, #tpu.memory_space<vmem>>, vector<1x6x128xf32>
    %83 = vector.shape_cast %82 : vector<1x6x128xf32> to vector<6x128xf32>
    %84 = arith.truncf %83 : vector<6x128xf32> to vector<6x128xbf16>
    %c1_105 = arith.constant 1 : index
    %c0_106 = arith.constant 0 : index
    %c2_107 = arith.constant 2 : index
    %c0_108 = arith.constant 0 : index
    %c0_109 = arith.constant 0 : index
    %85 = vector.load %arg2[%c1_105, %c0_106, %c2_107, %c0_108, %c0_109] : memref<2x2x5x128x36xbf16, #tpu.memory_space<vmem>>, vector<1x1x1x128x36xbf16>
    %86 = vector.shape_cast %85 : vector<1x1x1x128x36xbf16> to vector<128x36xbf16>
    %cst_110 = arith.constant dense<0.000000e+00> : vector<6x36xf32>
    %87 = tpu.matmul %84, %86, %cst_110 {dimension_numbers = #tpu.dot_dimension_numbers<[1], [0], [0], [1], [0, 0, 1, 1], [], []>} : vector<6x128xbf16>, vector<128x36xbf16>, vector<6x36xf32> -> vector<6x36xf32>
    %88 = arith.addf %81, %87 : vector<6x36xf32>
    %c0_111 = arith.constant 0 : index
    %c2_112 = arith.constant 2 : index
    %c0_113 = arith.constant 0 : index
    %89 = vector.load %arg1[%c0_111, %c2_112, %c0_113] : memref<1x8x128xf32, #tpu.memory_space<vmem>>, vector<1x6x128xf32>
    %90 = vector.shape_cast %89 : vector<1x6x128xf32> to vector<6x128xf32>
    %91 = arith.truncf %90 : vector<6x128xf32> to vector<6x128xbf16>
    %c1_114 = arith.constant 1 : index
    %c0_115 = arith.constant 0 : index
    %c3_116 = arith.constant 3 : index
    %c0_117 = arith.constant 0 : index
    %c0_118 = arith.constant 0 : index
    %92 = vector.load %arg2[%c1_114, %c0_115, %c3_116, %c0_117, %c0_118] : memref<2x2x5x128x36xbf16, #tpu.memory_space<vmem>>, vector<1x1x1x128x36xbf16>
    %93 = vector.shape_cast %92 : vector<1x1x1x128x36xbf16> to vector<128x36xbf16>
    %cst_119 = arith.constant dense<0.000000e+00> : vector<6x36xf32>
    %94 = tpu.matmul %91, %93, %cst_119 {dimension_numbers = #tpu.dot_dimension_numbers<[1], [0], [0], [1], [0, 0, 1, 1], [], []>} : vector<6x128xbf16>, vector<128x36xbf16>, vector<6x36xf32> -> vector<6x36xf32>
    %95 = arith.addf %88, %94 : vector<6x36xf32>
    %c0_120 = arith.constant 0 : index
    %c2_121 = arith.constant 2 : index
    %c0_122 = arith.constant 0 : index
    %96 = vector.load %arg1[%c0_120, %c2_121, %c0_122] : memref<1x8x128xf32, #tpu.memory_space<vmem>>, vector<1x6x128xf32>
    %97 = vector.shape_cast %96 : vector<1x6x128xf32> to vector<6x128xf32>
    %98 = arith.truncf %97 : vector<6x128xf32> to vector<6x128xbf16>
    %c1_123 = arith.constant 1 : index
    %c0_124 = arith.constant 0 : index
    %c4_125 = arith.constant 4 : index
    %c0_126 = arith.constant 0 : index
    %c0_127 = arith.constant 0 : index
    %99 = vector.load %arg2[%c1_123, %c0_124, %c4_125, %c0_126, %c0_127] : memref<2x2x5x128x36xbf16, #tpu.memory_space<vmem>>, vector<1x1x1x128x36xbf16>
    %100 = vector.shape_cast %99 : vector<1x1x1x128x36xbf16> to vector<128x36xbf16>
    %cst_128 = arith.constant dense<0.000000e+00> : vector<6x36xf32>
    %101 = tpu.matmul %98, %100, %cst_128 {dimension_numbers = #tpu.dot_dimension_numbers<[1], [0], [0], [1], [0, 0, 1, 1], [], []>} : vector<6x128xbf16>, vector<128x36xbf16>, vector<6x36xf32> -> vector<6x36xf32>
    %102 = arith.addf %95, %101 : vector<6x36xf32>
    %103 = arith.maximumf %68, %102 : vector<6x36xf32>
    %c0_129 = arith.constant 0 : index
    %c0_130 = arith.constant 0 : index
    %c0_131 = arith.constant 0 : index
    %104 = vector.load %arg1[%c0_129, %c0_130, %c0_131] : memref<1x8x128xf32, #tpu.memory_space<vmem>>, vector<1x6x128xf32>
    %105 = vector.shape_cast %104 : vector<1x6x128xf32> to vector<6x128xf32>
    %106 = arith.truncf %105 : vector<6x128xf32> to vector<6x128xbf16>
    %c1_132 = arith.constant 1 : index
    %c1_133 = arith.constant 1 : index
    %c0_134 = arith.constant 0 : index
    %c0_135 = arith.constant 0 : index
    %c0_136 = arith.constant 0 : index
    %107 = vector.load %arg2[%c1_132, %c1_133, %c0_134, %c0_135, %c0_136] : memref<2x2x5x128x36xbf16, #tpu.memory_space<vmem>>, vector<1x1x1x128x36xbf16>
    %108 = vector.shape_cast %107 : vector<1x1x1x128x36xbf16> to vector<128x36xbf16>
    %cst_137 = arith.constant dense<0.000000e+00> : vector<6x36xf32>
    %109 = tpu.matmul %106, %108, %cst_137 {dimension_numbers = #tpu.dot_dimension_numbers<[1], [0], [0], [1], [0, 0, 1, 1], [], []>} : vector<6x128xbf16>, vector<128x36xbf16>, vector<6x36xf32> -> vector<6x36xf32>
    %c0_138 = arith.constant 0 : index
    %c1_139 = arith.constant 1 : index
    %c0_140 = arith.constant 0 : index
    %110 = vector.load %arg1[%c0_138, %c1_139, %c0_140] : memref<1x8x128xf32, #tpu.memory_space<vmem>>, vector<1x6x128xf32>
    %111 = vector.shape_cast %110 : vector<1x6x128xf32> to vector<6x128xf32>
    %112 = arith.truncf %111 : vector<6x128xf32> to vector<6x128xbf16>
    %c1_141 = arith.constant 1 : index
    %c1_142 = arith.constant 1 : index
    %c1_143 = arith.constant 1 : index
    %c0_144 = arith.constant 0 : index
    %c0_145 = arith.constant 0 : index
    %113 = vector.load %arg2[%c1_141, %c1_142, %c1_143, %c0_144, %c0_145] : memref<2x2x5x128x36xbf16, #tpu.memory_space<vmem>>, vector<1x1x1x128x36xbf16>
    %114 = vector.shape_cast %113 : vector<1x1x1x128x36xbf16> to vector<128x36xbf16>
    %cst_146 = arith.constant dense<0.000000e+00> : vector<6x36xf32>
    %115 = tpu.matmul %112, %114, %cst_146 {dimension_numbers = #tpu.dot_dimension_numbers<[1], [0], [0], [1], [0, 0, 1, 1], [], []>} : vector<6x128xbf16>, vector<128x36xbf16>, vector<6x36xf32> -> vector<6x36xf32>
    %116 = arith.addf %109, %115 : vector<6x36xf32>
    %c0_147 = arith.constant 0 : index
    %c1_148 = arith.constant 1 : index
    %c0_149 = arith.constant 0 : index
    %117 = vector.load %arg1[%c0_147, %c1_148, %c0_149] : memref<1x8x128xf32, #tpu.memory_space<vmem>>, vector<1x6x128xf32>
    %118 = vector.shape_cast %117 : vector<1x6x128xf32> to vector<6x128xf32>
    %119 = arith.truncf %118 : vector<6x128xf32> to vector<6x128xbf16>
    %c1_150 = arith.constant 1 : index
    %c1_151 = arith.constant 1 : index
    %c2_152 = arith.constant 2 : index
    %c0_153 = arith.constant 0 : index
    %c0_154 = arith.constant 0 : index
    %120 = vector.load %arg2[%c1_150, %c1_151, %c2_152, %c0_153, %c0_154] : memref<2x2x5x128x36xbf16, #tpu.memory_space<vmem>>, vector<1x1x1x128x36xbf16>
    %121 = vector.shape_cast %120 : vector<1x1x1x128x36xbf16> to vector<128x36xbf16>
    %cst_155 = arith.constant dense<0.000000e+00> : vector<6x36xf32>
    %122 = tpu.matmul %119, %121, %cst_155 {dimension_numbers = #tpu.dot_dimension_numbers<[1], [0], [0], [1], [0, 0, 1, 1], [], []>} : vector<6x128xbf16>, vector<128x36xbf16>, vector<6x36xf32> -> vector<6x36xf32>
    %123 = arith.addf %116, %122 : vector<6x36xf32>
    %c0_156 = arith.constant 0 : index
    %c2_157 = arith.constant 2 : index
    %c0_158 = arith.constant 0 : index
    %124 = vector.load %arg1[%c0_156, %c2_157, %c0_158] : memref<1x8x128xf32, #tpu.memory_space<vmem>>, vector<1x6x128xf32>
    %125 = vector.shape_cast %124 : vector<1x6x128xf32> to vector<6x128xf32>
    %126 = arith.truncf %125 : vector<6x128xf32> to vector<6x128xbf16>
    %c1_159 = arith.constant 1 : index
    %c1_160 = arith.constant 1 : index
    %c3_161 = arith.constant 3 : index
    %c0_162 = arith.constant 0 : index
    %c0_163 = arith.constant 0 : index
    %127 = vector.load %arg2[%c1_159, %c1_160, %c3_161, %c0_162, %c0_163] : memref<2x2x5x128x36xbf16, #tpu.memory_space<vmem>>, vector<1x1x1x128x36xbf16>
    %128 = vector.shape_cast %127 : vector<1x1x1x128x36xbf16> to vector<128x36xbf16>
    %cst_164 = arith.constant dense<0.000000e+00> : vector<6x36xf32>
    %129 = tpu.matmul %126, %128, %cst_164 {dimension_numbers = #tpu.dot_dimension_numbers<[1], [0], [0], [1], [0, 0, 1, 1], [], []>} : vector<6x128xbf16>, vector<128x36xbf16>, vector<6x36xf32> -> vector<6x36xf32>
    %130 = arith.addf %123, %129 : vector<6x36xf32>
    %c0_165 = arith.constant 0 : index
    %c2_166 = arith.constant 2 : index
    %c0_167 = arith.constant 0 : index
    %131 = vector.load %arg1[%c0_165, %c2_166, %c0_167] : memref<1x8x128xf32, #tpu.memory_space<vmem>>, vector<1x6x128xf32>
    %132 = vector.shape_cast %131 : vector<1x6x128xf32> to vector<6x128xf32>
    %133 = arith.truncf %132 : vector<6x128xf32> to vector<6x128xbf16>
    %c1_168 = arith.constant 1 : index
    %c1_169 = arith.constant 1 : index
    %c4_170 = arith.constant 4 : index
    %c0_171 = arith.constant 0 : index
    %c0_172 = arith.constant 0 : index
    %134 = vector.load %arg2[%c1_168, %c1_169, %c4_170, %c0_171, %c0_172] : memref<2x2x5x128x36xbf16, #tpu.memory_space<vmem>>, vector<1x1x1x128x36xbf16>
    %135 = vector.shape_cast %134 : vector<1x1x1x128x36xbf16> to vector<128x36xbf16>
    %cst_173 = arith.constant dense<0.000000e+00> : vector<6x36xf32>
    %136 = tpu.matmul %133, %135, %cst_173 {dimension_numbers = #tpu.dot_dimension_numbers<[1], [0], [0], [1], [0, 0, 1, 1], [], []>} : vector<6x128xbf16>, vector<128x36xbf16>, vector<6x36xf32> -> vector<6x36xf32>
    %137 = arith.addf %130, %136 : vector<6x36xf32>
    %138 = arith.maximumf %103, %137 : vector<6x36xf32>
    %c0_174 = arith.constant 0 : index
    %c0_175 = arith.constant 0 : index
    %139 = vector.load %arg3[%c0_174, %c0_175] : memref<1x36xf32, #tpu.memory_space<vmem>>, vector<1x36xf32>
    %140 = vector.broadcast %139 : vector<1x36xf32> to vector<6x36xf32>
    %141 = arith.addf %138, %140 : vector<6x36xf32>
    %cst_176 = arith.constant 0.000000e+00 : f32
    %142 = vector.broadcast %cst_176 : f32 to vector<6x36xf32>
    %143 = arith.cmpf ogt, %141, %142 : vector<6x36xf32>
    %cst_177 = arith.constant 0.000000e+00 : f32
    %144 = vector.broadcast %cst_177 : f32 to vector<6x36xf32>
    %145 = arith.minimumf %141, %144 : vector<6x36xf32>
    %146 = math.exp %145 : vector<6x36xf32>
    %cst_178 = arith.constant 1.000000e+00 : f32
    %147 = vector.broadcast %cst_178 : f32 to vector<6x36xf32>
    %148 = arith.subf %146, %147 : vector<6x36xf32>
    %149 = arith.select %143, %141, %148 : vector<6x36xi1>, vector<6x36xf32>
    %150 = vector.extract_strided_slice %149 {offsets = [0, 0], sizes = [2, 36], strides = [1, 1]} : vector<6x36xf32> to vector<2x36xf32>
    %151 = arith.truncf %150 : vector<2x36xf32> to vector<2x36xbf16>
    %c0_179 = arith.constant 0 : index
    %c0_180 = arith.constant 0 : index
    %c0_181 = arith.constant 0 : index
    %c0_182 = arith.constant 0 : index
    %152 = vector.load %arg4[%c0_179, %c0_180, %c0_181, %c0_182] : memref<2x5x36x16xbf16, #tpu.memory_space<vmem>>, vector<1x1x36x16xbf16>
    %153 = vector.shape_cast %152 : vector<1x1x36x16xbf16> to vector<36x16xbf16>
    %cst_183 = arith.constant dense<0.000000e+00> : vector<2x16xf32>
    %154 = tpu.matmul %151, %153, %cst_183 {dimension_numbers = #tpu.dot_dimension_numbers<[1], [0], [0], [1], [0, 0, 1, 1], [], []>} : vector<2x36xbf16>, vector<36x16xbf16>, vector<2x16xf32> -> vector<2x16xf32>
    %155 = vector.extract_strided_slice %149 {offsets = [1, 0], sizes = [2, 36], strides = [1, 1]} : vector<6x36xf32> to vector<2x36xf32>
    %156 = arith.truncf %155 : vector<2x36xf32> to vector<2x36xbf16>
    %c0_184 = arith.constant 0 : index
    %c1_185 = arith.constant 1 : index
    %c0_186 = arith.constant 0 : index
    %c0_187 = arith.constant 0 : index
    %157 = vector.load %arg4[%c0_184, %c1_185, %c0_186, %c0_187] : memref<2x5x36x16xbf16, #tpu.memory_space<vmem>>, vector<1x1x36x16xbf16>
    %158 = vector.shape_cast %157 : vector<1x1x36x16xbf16> to vector<36x16xbf16>
    %cst_188 = arith.constant dense<0.000000e+00> : vector<2x16xf32>
    %159 = tpu.matmul %156, %158, %cst_188 {dimension_numbers = #tpu.dot_dimension_numbers<[1], [0], [0], [1], [0, 0, 1, 1], [], []>} : vector<2x36xbf16>, vector<36x16xbf16>, vector<2x16xf32> -> vector<2x16xf32>
    %160 = arith.addf %154, %159 : vector<2x16xf32>
    %161 = vector.extract_strided_slice %149 {offsets = [2, 0], sizes = [2, 36], strides = [1, 1]} : vector<6x36xf32> to vector<2x36xf32>
    %162 = arith.truncf %161 : vector<2x36xf32> to vector<2x36xbf16>
    %c0_189 = arith.constant 0 : index
    %c2_190 = arith.constant 2 : index
    %c0_191 = arith.constant 0 : index
    %c0_192 = arith.constant 0 : index
    %163 = vector.load %arg4[%c0_189, %c2_190, %c0_191, %c0_192] : memref<2x5x36x16xbf16, #tpu.memory_space<vmem>>, vector<1x1x36x16xbf16>
    %164 = vector.shape_cast %163 : vector<1x1x36x16xbf16> to vector<36x16xbf16>
    %cst_193 = arith.constant dense<0.000000e+00> : vector<2x16xf32>
    %165 = tpu.matmul %162, %164, %cst_193 {dimension_numbers = #tpu.dot_dimension_numbers<[1], [0], [0], [1], [0, 0, 1, 1], [], []>} : vector<2x36xbf16>, vector<36x16xbf16>, vector<2x16xf32> -> vector<2x16xf32>
    %166 = arith.addf %160, %165 : vector<2x16xf32>
    %167 = vector.extract_strided_slice %149 {offsets = [3, 0], sizes = [2, 36], strides = [1, 1]} : vector<6x36xf32> to vector<2x36xf32>
    %168 = arith.truncf %167 : vector<2x36xf32> to vector<2x36xbf16>
    %c0_194 = arith.constant 0 : index
    %c3_195 = arith.constant 3 : index
    %c0_196 = arith.constant 0 : index
    %c0_197 = arith.constant 0 : index
    %169 = vector.load %arg4[%c0_194, %c3_195, %c0_196, %c0_197] : memref<2x5x36x16xbf16, #tpu.memory_space<vmem>>, vector<1x1x36x16xbf16>
    %170 = vector.shape_cast %169 : vector<1x1x36x16xbf16> to vector<36x16xbf16>
    %cst_198 = arith.constant dense<0.000000e+00> : vector<2x16xf32>
    %171 = tpu.matmul %168, %170, %cst_198 {dimension_numbers = #tpu.dot_dimension_numbers<[1], [0], [0], [1], [0, 0, 1, 1], [], []>} : vector<2x36xbf16>, vector<36x16xbf16>, vector<2x16xf32> -> vector<2x16xf32>
    %172 = arith.addf %166, %171 : vector<2x16xf32>
    %173 = vector.extract_strided_slice %149 {offsets = [4, 0], sizes = [2, 36], strides = [1, 1]} : vector<6x36xf32> to vector<2x36xf32>
    %174 = arith.truncf %173 : vector<2x36xf32> to vector<2x36xbf16>
    %c0_199 = arith.constant 0 : index
    %c4_200 = arith.constant 4 : index
    %c0_201 = arith.constant 0 : index
    %c0_202 = arith.constant 0 : index
    %175 = vector.load %arg4[%c0_199, %c4_200, %c0_201, %c0_202] : memref<2x5x36x16xbf16, #tpu.memory_space<vmem>>, vector<1x1x36x16xbf16>
    %176 = vector.shape_cast %175 : vector<1x1x36x16xbf16> to vector<36x16xbf16>
    %cst_203 = arith.constant dense<0.000000e+00> : vector<2x16xf32>
    %177 = tpu.matmul %174, %176, %cst_203 {dimension_numbers = #tpu.dot_dimension_numbers<[1], [0], [0], [1], [0, 0, 1, 1], [], []>} : vector<2x36xbf16>, vector<36x16xbf16>, vector<2x16xf32> -> vector<2x16xf32>
    %178 = arith.addf %172, %177 : vector<2x16xf32>
    %179 = vector.extract_strided_slice %149 {offsets = [0, 0], sizes = [2, 36], strides = [1, 1]} : vector<6x36xf32> to vector<2x36xf32>
    %180 = arith.truncf %179 : vector<2x36xf32> to vector<2x36xbf16>
    %c1_204 = arith.constant 1 : index
    %c0_205 = arith.constant 0 : index
    %c0_206 = arith.constant 0 : index
    %c0_207 = arith.constant 0 : index
    %181 = vector.load %arg4[%c1_204, %c0_205, %c0_206, %c0_207] : memref<2x5x36x16xbf16, #tpu.memory_space<vmem>>, vector<1x1x36x16xbf16>
    %182 = vector.shape_cast %181 : vector<1x1x36x16xbf16> to vector<36x16xbf16>
    %cst_208 = arith.constant dense<0.000000e+00> : vector<2x16xf32>
    %183 = tpu.matmul %180, %182, %cst_208 {dimension_numbers = #tpu.dot_dimension_numbers<[1], [0], [0], [1], [0, 0, 1, 1], [], []>} : vector<2x36xbf16>, vector<36x16xbf16>, vector<2x16xf32> -> vector<2x16xf32>
    %184 = vector.extract_strided_slice %149 {offsets = [1, 0], sizes = [2, 36], strides = [1, 1]} : vector<6x36xf32> to vector<2x36xf32>
    %185 = arith.truncf %184 : vector<2x36xf32> to vector<2x36xbf16>
    %c1_209 = arith.constant 1 : index
    %c1_210 = arith.constant 1 : index
    %c0_211 = arith.constant 0 : index
    %c0_212 = arith.constant 0 : index
    %186 = vector.load %arg4[%c1_209, %c1_210, %c0_211, %c0_212] : memref<2x5x36x16xbf16, #tpu.memory_space<vmem>>, vector<1x1x36x16xbf16>
    %187 = vector.shape_cast %186 : vector<1x1x36x16xbf16> to vector<36x16xbf16>
    %cst_213 = arith.constant dense<0.000000e+00> : vector<2x16xf32>
    %188 = tpu.matmul %185, %187, %cst_213 {dimension_numbers = #tpu.dot_dimension_numbers<[1], [0], [0], [1], [0, 0, 1, 1], [], []>} : vector<2x36xbf16>, vector<36x16xbf16>, vector<2x16xf32> -> vector<2x16xf32>
    %189 = arith.addf %183, %188 : vector<2x16xf32>
    %190 = vector.extract_strided_slice %149 {offsets = [2, 0], sizes = [2, 36], strides = [1, 1]} : vector<6x36xf32> to vector<2x36xf32>
    %191 = arith.truncf %190 : vector<2x36xf32> to vector<2x36xbf16>
    %c1_214 = arith.constant 1 : index
    %c2_215 = arith.constant 2 : index
    %c0_216 = arith.constant 0 : index
    %c0_217 = arith.constant 0 : index
    %192 = vector.load %arg4[%c1_214, %c2_215, %c0_216, %c0_217] : memref<2x5x36x16xbf16, #tpu.memory_space<vmem>>, vector<1x1x36x16xbf16>
    %193 = vector.shape_cast %192 : vector<1x1x36x16xbf16> to vector<36x16xbf16>
    %cst_218 = arith.constant dense<0.000000e+00> : vector<2x16xf32>
    %194 = tpu.matmul %191, %193, %cst_218 {dimension_numbers = #tpu.dot_dimension_numbers<[1], [0], [0], [1], [0, 0, 1, 1], [], []>} : vector<2x36xbf16>, vector<36x16xbf16>, vector<2x16xf32> -> vector<2x16xf32>
    %195 = arith.addf %189, %194 : vector<2x16xf32>
    %196 = vector.extract_strided_slice %149 {offsets = [3, 0], sizes = [2, 36], strides = [1, 1]} : vector<6x36xf32> to vector<2x36xf32>
    %197 = arith.truncf %196 : vector<2x36xf32> to vector<2x36xbf16>
    %c1_219 = arith.constant 1 : index
    %c3_220 = arith.constant 3 : index
    %c0_221 = arith.constant 0 : index
    %c0_222 = arith.constant 0 : index
    %198 = vector.load %arg4[%c1_219, %c3_220, %c0_221, %c0_222] : memref<2x5x36x16xbf16, #tpu.memory_space<vmem>>, vector<1x1x36x16xbf16>
    %199 = vector.shape_cast %198 : vector<1x1x36x16xbf16> to vector<36x16xbf16>
    %cst_223 = arith.constant dense<0.000000e+00> : vector<2x16xf32>
    %200 = tpu.matmul %197, %199, %cst_223 {dimension_numbers = #tpu.dot_dimension_numbers<[1], [0], [0], [1], [0, 0, 1, 1], [], []>} : vector<2x36xbf16>, vector<36x16xbf16>, vector<2x16xf32> -> vector<2x16xf32>
    %201 = arith.addf %195, %200 : vector<2x16xf32>
    %202 = vector.extract_strided_slice %149 {offsets = [4, 0], sizes = [2, 36], strides = [1, 1]} : vector<6x36xf32> to vector<2x36xf32>
    %203 = arith.truncf %202 : vector<2x36xf32> to vector<2x36xbf16>
    %c1_224 = arith.constant 1 : index
    %c4_225 = arith.constant 4 : index
    %c0_226 = arith.constant 0 : index
    %c0_227 = arith.constant 0 : index
    %204 = vector.load %arg4[%c1_224, %c4_225, %c0_226, %c0_227] : memref<2x5x36x16xbf16, #tpu.memory_space<vmem>>, vector<1x1x36x16xbf16>
    %205 = vector.shape_cast %204 : vector<1x1x36x16xbf16> to vector<36x16xbf16>
    %cst_228 = arith.constant dense<0.000000e+00> : vector<2x16xf32>
    %206 = tpu.matmul %203, %205, %cst_228 {dimension_numbers = #tpu.dot_dimension_numbers<[1], [0], [0], [1], [0, 0, 1, 1], [], []>} : vector<2x36xbf16>, vector<36x16xbf16>, vector<2x16xf32> -> vector<2x16xf32>
    %207 = arith.addf %201, %206 : vector<2x16xf32>
    %208 = arith.maximumf %178, %207 : vector<2x16xf32>
    %209 = vector.extract_strided_slice %208 {offsets = [0, 0], sizes = [1, 16], strides = [1, 1]} : vector<2x16xf32> to vector<1x16xf32>
    %210 = vector.extract_strided_slice %208 {offsets = [1, 0], sizes = [1, 16], strides = [1, 1]} : vector<2x16xf32> to vector<1x16xf32>
    %211 = arith.maximumf %209, %210 : vector<1x16xf32>
    %c0_229 = arith.constant 0 : index
    %c0_230 = arith.constant 0 : index
    %212 = vector.load %arg5[%c0_229, %c0_230] : memref<1x16xf32, #tpu.memory_space<vmem>>, vector<1x16xf32>
    %213 = arith.addf %211, %212 : vector<1x16xf32>
    %cst_231 = arith.constant 0.000000e+00 : f32
    %214 = vector.broadcast %cst_231 : f32 to vector<1x16xf32>
    %215 = arith.cmpf ogt, %213, %214 : vector<1x16xf32>
    %cst_232 = arith.constant 0.000000e+00 : f32
    %216 = vector.broadcast %cst_232 : f32 to vector<1x16xf32>
    %217 = arith.minimumf %213, %216 : vector<1x16xf32>
    %218 = math.exp %217 : vector<1x16xf32>
    %cst_233 = arith.constant 1.000000e+00 : f32
    %219 = vector.broadcast %cst_233 : f32 to vector<1x16xf32>
    %220 = arith.subf %218, %219 : vector<1x16xf32>
    %221 = arith.select %215, %213, %220 : vector<1x16xi1>, vector<1x16xf32>
    %222 = arith.truncf %221 : vector<1x16xf32> to vector<1x16xbf16>
    %c0_234 = arith.constant 0 : index
    %c0_235 = arith.constant 0 : index
    %223 = vector.load %arg6[%c0_234, %c0_235] : memref<16x128xbf16, #tpu.memory_space<vmem>>, vector<16x128xbf16>
    %cst_236 = arith.constant dense<0.000000e+00> : vector<1x128xf32>
    %224 = tpu.matmul %222, %223, %cst_236 {dimension_numbers = #tpu.dot_dimension_numbers<[1], [0], [0], [1], [0, 0, 1, 1], [], []>} : vector<1x16xbf16>, vector<16x128xbf16>, vector<1x128xf32> -> vector<1x128xf32>
    %c0_237 = arith.constant 0 : index
    %c0_238 = arith.constant 0 : index
    %225 = vector.load %arg7[%c0_237, %c0_238] : memref<1x128xf32, #tpu.memory_space<vmem>>, vector<1x128xf32>
    %226 = arith.addf %224, %225 : vector<1x128xf32>
    %cst_239 = arith.constant 0.000000e+00 : f32
    %227 = vector.broadcast %cst_239 : f32 to vector<1x128xf32>
    %228 = arith.cmpf ogt, %226, %227 : vector<1x128xf32>
    %cst_240 = arith.constant 0.000000e+00 : f32
    %229 = vector.broadcast %cst_240 : f32 to vector<1x128xf32>
    %230 = arith.minimumf %226, %229 : vector<1x128xf32>
    %231 = math.exp %230 : vector<1x128xf32>
    %cst_241 = arith.constant 1.000000e+00 : f32
    %232 = vector.broadcast %cst_241 : f32 to vector<1x128xf32>
    %233 = arith.subf %231, %232 : vector<1x128xf32>
    %234 = arith.select %228, %226, %233 : vector<1x128xi1>, vector<1x128xf32>
    %235 = arith.truncf %234 : vector<1x128xf32> to vector<1x128xbf16>
    %c0_242 = arith.constant 0 : index
    %c0_243 = arith.constant 0 : index
    %236 = vector.load %arg8[%c0_242, %c0_243] : memref<128x128xbf16, #tpu.memory_space<vmem>>, vector<128x128xbf16>
    %cst_244 = arith.constant dense<0.000000e+00> : vector<1x128xf32>
    %237 = tpu.matmul %235, %236, %cst_244 {dimension_numbers = #tpu.dot_dimension_numbers<[1], [0], [0], [1], [0, 0, 1, 1], [], []>} : vector<1x128xbf16>, vector<128x128xbf16>, vector<1x128xf32> -> vector<1x128xf32>
    %c0_245 = arith.constant 0 : index
    %c0_246 = arith.constant 0 : index
    %238 = vector.load %arg9[%c0_245, %c0_246] : memref<1x128xf32, #tpu.memory_space<vmem>>, vector<1x128xf32>
    %239 = arith.addf %237, %238 : vector<1x128xf32>
    %cst_247 = arith.constant 0.000000e+00 : f32
    %240 = vector.broadcast %cst_247 : f32 to vector<1x128xf32>
    %241 = arith.cmpf ogt, %239, %240 : vector<1x128xf32>
    %cst_248 = arith.constant 0.000000e+00 : f32
    %242 = vector.broadcast %cst_248 : f32 to vector<1x128xf32>
    %243 = arith.minimumf %239, %242 : vector<1x128xf32>
    %244 = math.exp %243 : vector<1x128xf32>
    %cst_249 = arith.constant 1.000000e+00 : f32
    %245 = vector.broadcast %cst_249 : f32 to vector<1x128xf32>
    %246 = arith.subf %244, %245 : vector<1x128xf32>
    %247 = arith.select %241, %239, %246 : vector<1x128xi1>, vector<1x128xf32>
    %248 = arith.truncf %247 : vector<1x128xf32> to vector<1x128xbf16>
    %c0_250 = arith.constant 0 : index
    %c0_251 = arith.constant 0 : index
    %249 = vector.load %arg10[%c0_250, %c0_251] : memref<128x128xbf16, #tpu.memory_space<vmem>>, vector<128x128xbf16>
    %cst_252 = arith.constant dense<0.000000e+00> : vector<1x128xf32>
    %250 = tpu.matmul %248, %249, %cst_252 {dimension_numbers = #tpu.dot_dimension_numbers<[1], [0], [0], [1], [0, 0, 1, 1], [], []>} : vector<1x128xbf16>, vector<128x128xbf16>, vector<1x128xf32> -> vector<1x128xf32>
    %c0_253 = arith.constant 0 : index
    %c0_254 = arith.constant 0 : index
    %251 = vector.load %arg11[%c0_253, %c0_254] : memref<1x128xf32, #tpu.memory_space<vmem>>, vector<1x128xf32>
    %252 = arith.addf %250, %251 : vector<1x128xf32>
    %253 = tpu.iota {dimensions = array<i32: 1>} : vector<1x128xi32>
    %c3_i32 = arith.constant 3 : i32
    %254 = vector.broadcast %c3_i32 : i32 to vector<1x128xi32>
    %255 = arith.cmpi slt, %253, %254 : vector<1x128xi32>
    %cst_255 = arith.constant -1.000000e+30 : f32
    %256 = vector.broadcast %cst_255 : f32 to vector<1x128xf32>
    %257 = arith.select %255, %252, %256 : vector<1x128xi1>, vector<1x128xf32>
    %cst_256 = arith.constant dense<0xFF800000> : vector<1xf32>
    %258 = vector.multi_reduction <maximumf>, %257, %cst_256 [1] : vector<1x128xf32> to vector<1xf32>
    %259 = vector.shape_cast %258 : vector<1xf32> to vector<1x1xf32>
    %260 = vector.broadcast %259 : vector<1x1xf32> to vector<1x128xf32>
    %261 = arith.subf %257, %260 : vector<1x128xf32>
    %262 = math.exp %261 : vector<1x128xf32>
    %cst_257 = arith.constant dense<0.000000e+00> : vector<1xf32>
    %263 = vector.multi_reduction <add>, %262, %cst_257 [1] : vector<1x128xf32> to vector<1xf32>
    %264 = vector.shape_cast %263 : vector<1xf32> to vector<1x1xf32>
    %265 = tpu.reciprocal %264 {approx = true} : vector<1x1xf32> -> vector<1x1xf32>
    %266 = arith.mulf %264, %265 : vector<1x1xf32>
    %cst_258 = arith.constant 2.000000e+00 : f32
    %267 = vector.broadcast %cst_258 : f32 to vector<1x1xf32>
    %268 = arith.subf %267, %266 : vector<1x1xf32>
    %269 = arith.mulf %265, %268 : vector<1x1xf32>
    %270 = vector.broadcast %269 : vector<1x1xf32> to vector<1x128xf32>
    %271 = arith.mulf %262, %270 : vector<1x128xf32>
    %c0_259 = arith.constant 0 : index
    %c0_260 = arith.constant 0 : index
    %c0_261 = arith.constant 0 : index
    %272 = vector.load %arg12[%c0_259, %c0_260, %c0_261] : memref<1x1x128xf32, #tpu.memory_space<vmem>>, vector<1x1x128xf32>
    %273 = vector.shape_cast %272 : vector<1x1x128xf32> to vector<1x128xf32>
    %274 = vector.shape_cast %271 : vector<1x128xf32> to vector<1x1x128xf32>
    tpu.vector_store %arg12[%c0_259, %c0_260, %c0_261], %274 {strides = array<i32>} : memref<1x1x128xf32, #tpu.memory_space<vmem>>, vector<1x1x128xf32>,
    return
  }
  func.func @transform_0(%arg0: i32) -> (i32, i32, i32) {
    %c0_i32 = arith.constant 0 : i32
    %c0_i32_0 = arith.constant 0 : i32
    %c0_i32_1 = arith.constant 0 : i32
    return %arg0, %c0_i32, %c0_i32_0 : i32, i32, i32
  }
  func.func @transform_1(%arg0: i32) -> (i32, i32, i32, i32, i32) {
    %c0_i32 = arith.constant 0 : i32
    %c0_i32_0 = arith.constant 0 : i32
    %c0_i32_1 = arith.constant 0 : i32
    %c0_i32_2 = arith.constant 0 : i32
    %c0_i32_3 = arith.constant 0 : i32
    %c0_i32_4 = arith.constant 0 : i32
    return %c0_i32, %c0_i32_0, %c0_i32_1, %c0_i32_2, %c0_i32_3 : i32, i32, i32, i32, i32
  }
  func.func @transform_2(%arg0: i32) -> (i32, i32) {
    %c0_i32 = arith.constant 0 : i32
    %c0_i32_0 = arith.constant 0 : i32
    %c0_i32_1 = arith.constant 0 : i32
    return %c0_i32, %c0_i32_0 : i32, i32
  }
  func.func @transform_3(%arg0: i32) -> (i32, i32, i32, i32) {
    %c0_i32 = arith.constant 0 : i32
    %c0_i32_0 = arith.constant 0 : i32
    %c0_i32_1 = arith.constant 0 : i32
    %c0_i32_2 = arith.constant 0 : i32
    %c0_i32_3 = arith.constant 0 : i32
    return %c0_i32, %c0_i32_0, %c0_i32_1, %c0_i32_2 : i32, i32, i32, i32
  }
  func.func @transform_4(%arg0: i32) -> (i32, i32) {
    %c0_i32 = arith.constant 0 : i32
    %c0_i32_0 = arith.constant 0 : i32
    %c0_i32_1 = arith.constant 0 : i32
    return %c0_i32, %c0_i32_0 : i32, i32
  }
  func.func @transform_5(%arg0: i32) -> (i32, i32) {
    %c0_i32 = arith.constant 0 : i32
    %c0_i32_0 = arith.constant 0 : i32
    %c0_i32_1 = arith.constant 0 : i32
    return %c0_i32, %c0_i32_0 : i32, i32
  }
  func.func @transform_6(%arg0: i32) -> (i32, i32) {
    %c0_i32 = arith.constant 0 : i32
    %c0_i32_0 = arith.constant 0 : i32
    %c0_i32_1 = arith.constant 0 : i32
    return %c0_i32, %c0_i32_0 : i32, i32
  }
  func.func @transform_7(%arg0: i32) -> (i32, i32) {
    %c0_i32 = arith.constant 0 : i32
    %c0_i32_0 = arith.constant 0 : i32
    %c0_i32_1 = arith.constant 0 : i32
    return %c0_i32, %c0_i32_0 : i32, i32
  }
  func.func @transform_8(%arg0: i32) -> (i32, i32) {
    %c0_i32 = arith.constant 0 : i32
    %c0_i32_0 = arith.constant 0 : i32
    %c0_i32_1 = arith.constant 0 : i32
    return %c0_i32, %c0_i32_0 : i32, i32
  }
  func.func @transform_9(%arg0: i32) -> (i32, i32) {
    %c0_i32 = arith.constant 0 : i32
    %c0_i32_0 = arith.constant 0 : i32
    %c0_i32_1 = arith.constant 0 : i32
    return %c0_i32, %c0_i32_0 : i32, i32
  }
  func.func @transform_10(%arg0: i32) -> (i32, i32) {
    %c0_i32 = arith.constant 0 : i32
    %c0_i32_0 = arith.constant 0 : i32
    %c0_i32_1 = arith.constant 0 : i32
    return %c0_i32, %c0_i32_0 : i32, i32
  }
  func.func @transform_11(%arg0: i32) -> (i32, i32, i32) {
    %c0_i32 = arith.constant 0 : i32
    %c0_i32_0 = arith.constant 0 : i32
    %c0_i32_1 = arith.constant 0 : i32
    return %arg0, %c0_i32, %c0_i32_0 : i32, i32, i32
  }
}

</mosaic_0001>

<bundles_post_ra>
// kernel: fair_cnn_forward.1
= control target key start
LH: loop header
LB: loop body
LE: loop exit
PB: predicated region body
PF: predicated region fallthrough
CT: control target
= control target key end

     0   :  { %s6495_s0 = inlined_call_operand.vmem [shape: f32[2,8,128], index: 0, kind: input, shape index: {}]   ;;  %s6496_s1 = inlined_call_operand.vmem [shape: bf16[2,2,5,128,36], index: 1, kind: input, shape index: {}]   ;;  %s6497_s2 = inlined_call_operand.vmem [shape: f32[1,36], index: 2, kind: input, shape index: {}]   ;;  %s6498_s3 = inlined_call_operand.vmem [shape: bf16[2,5,36,16], index: 3, kind: input, shape index: {}]   ;;  %s6499_s4 = inlined_call_operand.vmem [shape: f32[1,16], index: 4, kind: input, shape index: {}]   ;;  %s6500_s5 = inlined_call_operand.vmem [shape: bf16[16,128], index: 5, kind: input, shape index: {}]   ;;  %s6501_s6 = inlined_call_operand.vmem [shape: f32[1,128], index: 6, kind: input, shape index: {}]   ;;  %s6502_s7 = inlined_call_operand.vmem [shape: bf16[128,128], index: 7, kind: input, shape index: {}]   ;;  %s6503_s8 = inlined_call_operand.vmem [shape: f32[1,128], index: 8, kind: input, shape index: {}]   ;;  %s6504_s9 = inlined_call_operand.vmem [shape: bf16[128,128], index: 9, kind: input, shape index: {}]   ;;  %s6505_s10 = inlined_call_operand.vmem [shape: f32[1,128], index: 10, kind: input, shape index: {}]   ;;  %s6506_s11 = inlined_call_operand.hbm [shape: f32[2,1,128], index: 11, kind: output, shape index: {}]  }
   0x1   :  { %6507 = sst [smem:[#allocation5_spill]] %s6495_s0 }
   0x2   :  { %16 = vsyncpa [#allocation3], 0 }
   0x3   :  { %18 = vsyncpa [#allocation3 + $0x1], 0  ;;  %s5419_s17 = smov 0   ;;  %s5421_s18 = smov 0  }
   0x4   :  { %s5423_s19 = smov 0   ;;  %s5425_s20 = smov 0  }
   0x5 LB: > { %s5440_s21 = sadd.s32 4294967295, %s5354_s20   ;;  %s3570_s22 = sadd.s32 4294967294, %s5354_s20   ;;  %s5354_s20 = sphi %s5425_s20, %s6514_s20   ;;  %s5350_s19 = sphi %s5423_s19, %s6513_s19   ;;  %s5346_s18 = sphi %s5421_s18, %s6512_s18   ;;  %s5342_s17 = sphi %s5419_s17, %s6511_s17  }
   0x6   : > { %s5444_s23 = sadd.s32 1, %s5354_s20   ;;  %s267_s24 = sadd.s32 1, %s5350_s19 }
   0x7   : > { %s264_s25 = ssub.s32 %s5354_s20, %s5444_s23  ;;  %p277_p0 = scmp.ne.s32.totalorder %s5350_s19, %s5346_s18 }
   0x8   : > { %p265_p1 = scmp.eq.s32.totalorder %s264_s25, 0  ;;  %p278_p2 = scmp.eq.s32.totalorder %s5440_s21, 1 }
   0x9   : > { %p283_p3 = scmp.ne.s32.totalorder %s5346_s18, %s5342_s17  ;;  %p284_p4 = scmp.eq.s32.totalorder %s3570_s22, 1 }
   0xa   : > { %s5455_s26 = scalar_select %p265_p1, %s5350_s19, %s267_s24  }
   0xb   : > { %p5457_p5 = por %p278_p2, %p277_p0  ;;  %p5461_p6 = por %p284_p4, %p283_p3 }
   0xc   : > { %p3573_p7 = scmp.ge.s32.totalorder %s5354_s20, 1  ;;  %p339_p8 = scmp.lt.s32.totalorder %s5354_s20, 3 }
   0xe   : > { %p340_p9 = pnand %p3573_p7, %p339_p8 }
   0xf   : > { %v5073_v0 = vld [vmem:[%s6496_s1 + $0x40] sm:$0xff] (!%p340_p9)   ;;  %v5356_v1 = vmov (!%p340_p9), 0.0   ;;  %v5075_v3 = vld [vmem:[%s6496_s1 + $0x48] sm:$0xff] (!%p340_p9)   ;;  %vm5357_vm0 = vmmov (!%p340_p9), 0   ;;  %v5077_v5 = vld [vmem:[%s6496_s1 + $0x50] sm:$0xff] (!%p340_p9)   ;;  %p377_p10 = scmp.lt.s32.totalorder (!%p340_p9), %s5440_s21, 1 }
  0x10   : > { %343 = sbr.rel (%p340_p9) target bundleno = 1885 (0x75d), region = 64  ;;  %4390 = vmatprep.subr.bf16.mxu0 (!%p340_p9), %v5356_v1  ;;  %4490 = vmatprep.subr.bf16.mxu1 (!%p340_p9), %v5356_v1  ;;  %v5074_v2 = vld [vmem:[%s6496_s1 + $0x180] sm:$0xff] (!%p340_p9)   ;;  %v5076_v4 = vld [vmem:[%s6496_s1 + $0x188] sm:$0xff] (!%p340_p9)   ;;  %v5078_v6 = vld [vmem:[%s6496_s1 + $0x190] sm:$0xff] (!%p340_p9)   ;;  %s6510_s0 = sld [smem:[#allocation5_spill]] (!%p340_p9)  ;;  %vm2554_vm1 = vcmask (!%p340_p9), 1041408  }
  0x11   : > { %4391 = vmatpush3.bf16.msra.mxu0 (!%p340_p9), %v5073_v0  ;;  %4406 = vmatprep.mubr.msk.bf16.mxu0 (!%p340_p9), %vm5357_vm0, %v5356_v1  ;;  %v5079_v7 = vld [vmem:[%s6496_s1 + $0x58] sm:$0xff] (!%p340_p9)   ;;  %v5081_v9 = vld [vmem:[%s6496_s1 + $0x60] sm:$0xff] (!%p340_p9)   ;;  %v5083_v11 = vld [vmem:[%s6496_s1 + $0x68] sm:$0xff] (!%p340_p9)   ;;  %vm2550_vm3 = vcmask (!%p340_p9), 293888   ;;  %vm3214_vm5 = vcmask (!%p340_p9), 130048   ;;  %vm3486_vm9 = vcmask (!%p340_p9), 1040384  }
  0x12   : > { %4491 = vmatpush3.bf16.msra.mxu1 (!%p340_p9), %v5074_v2  ;;  %4392 = vmatprep.subr.bf16.mxu0 (!%p340_p9), %v5356_v1  ;;  %v5080_v8 = vld [vmem:[%s6496_s1 + $0x198] sm:$0xff] (!%p340_p9)   ;;  %v5082_v10 = vld [vmem:[%s6496_s1 + $0x1a0] sm:$0xff] (!%p340_p9)   ;;  %v5084_v12 = vld [vmem:[%s6496_s1 + $0x1a8] sm:$0xff] (!%p340_p9)   ;;  %s4147_s14 = sshll.u32 (!%p340_p9), %s5440_s21, 4 }
  0x13   : > { %4492 = vmatprep.subr.bf16.mxu1 (!%p340_p9), %v5356_v1  ;;  %4506 = vmatprep.mubr.msk.bf16.mxu1 (!%p340_p9), %vm5357_vm0, %v5356_v1  ;;  %v5085_v13 = vld [vmem:[%s6496_s1 + $0x70] sm:$0xff] (!%p340_p9)   ;;  %v5087_v15 = vld [vmem:[%s6496_s1 + $0x78] sm:$0xff] (!%p340_p9)   ;;  %v5089_v19 = vld [vmem:[%s6496_s1] sm:$0xff] (!%p340_p9)   ;;  %s6453_s25 = scalar_lea.hbm (!%p340_p9), %s6506_s11, %s4147_s14 }
  0x14   : > { %v5086_v14 = vld [vmem:[%s6496_s1 + $0x1b0] sm:$0xff] (!%p340_p9)   ;;  %v5088_v17 = vld [vmem:[%s6496_s1 + $0x1b8] sm:$0xff] (!%p340_p9)   ;;  %v5090_v20 = vld [vmem:[%s6496_s1 + $0x140] sm:$0xff] (!%p340_p9)  }
  0x15   : > { %4393 = vmatpush3.bf16.msra.mxu0 (!%p340_p9), %v5075_v3  ;;  %v5091_v21 = vld [vmem:[%s6496_s1 + $0x8] sm:$0xff] (!%p340_p9)   ;;  %v5093_v23 = vld [vmem:[%s6496_s1 + $0x10] sm:$0xff] (!%p340_p9)   ;;  %v5095_v25 = vld [vmem:[%s6496_s1 + $0x18] sm:$0xff] (!%p340_p9)  }
  0x16   : > { %4493 = vmatpush3.bf16.msra.mxu1 (!%p340_p9), %v5076_v4  ;;  %4394 = vmatprep.subr.bf16.mxu0 (!%p340_p9), %v5356_v1  ;;  %v5092_v22 = vld [vmem:[%s6496_s1 + $0x148] sm:$0xff] (!%p340_p9)   ;;  %v5094_v24 = vld [vmem:[%s6496_s1 + $0x150] sm:$0xff] (!%p340_p9)   ;;  %v5096_v26 = vld [vmem:[%s6496_s1 + $0x158] sm:$0xff] (!%p340_p9)  }
  0x17   : > { %4494 = vmatprep.subr.bf16.mxu1 %v5356_v1  ;;  %s378_s29 = scalar_select %p377_p10, %s5440_s21, 1  ;;  %v5097_v27 = vld [vmem:[%s6496_s1 + $0x20] sm:$0xff]   ;;  %v5099_v29 = vld [vmem:[%s6496_s1 + $0x28] sm:$0xff]   ;;  %v5101_v31 = vld [vmem:[%s6496_s1 + $0x30] sm:$0xff]  }
  0x18   : > { %v5098_v28 = vld [vmem:[%s6496_s1 + $0x160] sm:$0xff]   ;;  %v5100_v30 = vld [vmem:[%s6496_s1 + $0x168] sm:$0xff]   ;;  %v5102_v32 = vld [vmem:[%s6496_s1 + $0x170] sm:$0xff]   ;;  %s5358_s21 = smov [#allocation2]  }
  0x19   : > { %4395 = vmatpush3.bf16.msra.mxu0 %v5077_v5  ;;  %s3574_s15 = sshll.u32 %s378_s29, 3  ;;  %v5103_v33 = vld [vmem:[%s6496_s1 + $0x38] sm:$0xff]   ;;  %v5105_v35 = vld [vmem:[%s6496_s1 + $0x80] sm:$0xff]   ;;  %v5107_v37 = vld [vmem:[%s6496_s1 + $0x88] sm:$0xff]   ;;  %s5296_s29 = sshll.u32 %s5358_s21, 4  ;;  %s5297_s29 = int_to_ptr.vmem [resolvable:$false] %s5296_s29 }
  0x1a   : > { %4495 = vmatpush3.bf16.msra.mxu1 %v5078_v6  ;;  %4396 = vmatprep.subr.bf16.mxu0 %v5356_v1  ;;  %s5531_s13 = scalar_lea.vmem %s6510_s0, %s3574_s15  ;;  %v5104_v34 = vld [vmem:[%s6496_s1 + $0x178] sm:$0xff]   ;;  %v5106_v36 = vld [vmem:[%s6496_s1 + $0x1c0] sm:$0xff]   ;;  %v5108_v38 = vld [vmem:[%s6496_s1 + $0x1c8] sm:$0xff]   ;;  %s5298_s0 = scalar_lea.vmem %s5297_s29, 32 }
  0x1b   : > { %4496 = vmatprep.subr.bf16.mxu1 %v5356_v1  ;;  %v382_v16 = vld [vmem:[%s5531_s13] sm:$0x3f]  ;;  %v5109_v39 = vld [vmem:[%s6496_s1 + $0x90] sm:$0xff]   ;;  %v5111_v41 = vld [vmem:[%s6496_s1 + $0x98] sm:$0xff]  }
  0x1c   : > { %v5543_v18 = vpack.c.bf16 %v382_v16, %v382_v16  ;;  %v5110_v40 = vld [vmem:[%s6496_s1 + $0x1d0] sm:$0xff]   ;;  %v5112_v42 = vld [vmem:[%s6496_s1 + $0x1d8] sm:$0xff]   ;;  %v5113_v43 = vld [vmem:[%s6496_s1 + $0xa0] sm:$0xff]  }
  0x1d   : > { %4397 = vmatpush3.bf16.msra.mxu0 %v5079_v7  ;;  %v5114_v44 = vld [vmem:[%s6496_s1 + $0x1e0] sm:$0xff]   ;;  %v5115_v45 = vld [vmem:[%s6496_s1 + $0xa8] sm:$0xff]   ;;  %v5117_v47 = vld [vmem:[%s6496_s1 + $0xb0] sm:$0xff]  }
  0x1e   : > { %4497 = vmatpush3.bf16.msra.mxu1 %v5080_v8  ;;  %4398 = vmatprep.subr.bf16.mxu0 %v5356_v1  ;;  %v5116_v46 = vld [vmem:[%s6496_s1 + $0x1e8] sm:$0xff]   ;;  %v5118_v48 = vld [vmem:[%s6496_s1 + $0x1f0] sm:$0xff]   ;;  %v593_v49 = vld [vmem:[%s5531_s13 + $0x1] sm:$0x3f] }
  0x1f   : > { %4498 = vmatprep.subr.bf16.mxu1 %v5356_v1  ;;  %v5119_v50 = vld [vmem:[%s6496_s1 + $0xb8] sm:$0xff]   ;;  %v5686_v52 = vpack.c.bf16 %v593_v49, %v593_v49  ;;  %v5121_v53 = vld [vmem:[%s6496_s1 + $0xc0] sm:$0xff]   ;;  %v5123_v55 = vld [vmem:[%s6496_s1 + $0xc8] sm:$0xff]  }
  0x20   : > { %v5120_v51 = vld [vmem:[%s6496_s1 + $0x1f8] sm:$0xff]   ;;  %v5122_v54 = vld [vmem:[%s6496_s1 + $0x200] sm:$0xff]   ;;  %v5124_v56 = vld [vmem:[%s6496_s1 + $0x208] sm:$0xff]  }
  0x21   : > { %4399 = vmatpush3.bf16.msra.mxu0 %v5081_v9  ;;  %v5125_v57 = vld [vmem:[%s6496_s1 + $0xd0] sm:$0xff]   ;;  %v5127_v59 = vld [vmem:[%s6496_s1 + $0xd8] sm:$0xff]   ;;  %v5129_v61 = vld [vmem:[%s6496_s1 + $0xe0] sm:$0xff]  }
  0x22   : > { %4499 = vmatpush3.bf16.msra.mxu1 %v5082_v10  ;;  %4400 = vmatprep.subr.bf16.mxu0 %v5356_v1  ;;  %v5126_v58 = vld [vmem:[%s6496_s1 + $0x210] sm:$0xff]   ;;  %v5128_v60 = vld [vmem:[%s6496_s1 + $0x218] sm:$0xff]   ;;  %v5130_v62 = vld [vmem:[%s6496_s1 + $0x220] sm:$0xff]  }
  0x23   : > { %4500 = vmatprep.subr.bf16.mxu1 %v5356_v1  ;;  %v5131_v63 = vld [vmem:[%s6496_s1 + $0xe8] sm:$0xff]   ;;  %v5133_v2 = vld [vmem:[%s6496_s1 + $0xf0] sm:$0xff]   ;;  %v5135_v4 = vld [vmem:[%s6496_s1 + $0xf8] sm:$0xff]  }
  0x24   : > { %v5132_v0 = vld [vmem:[%s6496_s1 + $0x228] sm:$0xff]   ;;  %v5134_v3 = vld [vmem:[%s6496_s1 + $0x230] sm:$0xff]   ;;  %v5136_v5 = vld [vmem:[%s6496_s1 + $0x238] sm:$0xff]  }
  0x25   : > { %4401 = vmatpush3.bf16.msra.mxu0 %v5083_v11  ;;  %v5137_v6 = vld [vmem:[%s6496_s1 + $0x100] sm:$0xff]   ;;  %v5139_v8 = vld [vmem:[%s6496_s1 + $0x108] sm:$0xff]   ;;  %v5141_v10 = vld [vmem:[%s6496_s1 + $0x110] sm:$0xff]  }
  0x26   : > { %4501 = vmatpush3.bf16.msra.mxu1 %v5084_v12  ;;  %4402 = vmatprep.subr.bf16.mxu0 %v5356_v1  ;;  %v5138_v7 = vld [vmem:[%s6496_s1 + $0x240] sm:$0xff]   ;;  %v5140_v9 = vld [vmem:[%s6496_s1 + $0x248] sm:$0xff]   ;;  %v5142_v11 = vld [vmem:[%s6496_s1 + $0x250] sm:$0xff]  }
  0x27   : > { %4502 = vmatprep.subr.bf16.mxu1 %v5356_v1  ;;  %v5143_v12 = vld [vmem:[%s6496_s1 + $0x118] sm:$0xff]   ;;  %v5147_v16 = vld [vmem:[%s6496_s1 + $0x128] sm:$0xff]   ;;  %v5177_v49 = vld [vmem:[%s6496_s1 + $0x2a0] sm:$0xff]  }
  0x29   : > { %4403 = vmatpush3.bf16.msra.mxu0 %v5085_v13  ;;  %v5144_v13 = vld [vmem:[%s6496_s1 + $0x258] sm:$0xff]  }
  0x2a   : > { %4503 = vmatpush3.bf16.msra.mxu1 %v5086_v14  ;;  %4404 = vmatprep.subr.bf16.mxu0 %v5356_v1  ;;  %v5145_v14 = vld [vmem:[%s6496_s1 + $0x120] sm:$0xff]  }
  0x2b   : > { %4504 = vmatprep.subr.bf16.mxu1 %v5356_v1 }
  0x2d   : > { %4405 = vmatpush3.bf16.msra.mxu0 %v5087_v15  ;;  %v5146_v15 = vld [vmem:[%s6496_s1 + $0x260] sm:$0xff]  }
  0x2e   : > { %4505 = vmatpush3.bf16.msra.mxu1 %v5088_v17  ;;  %4410 = vmatprep.subr.bf16.mxu0 %v5356_v1  ;;  %v5148_v17 = vld [vmem:[%s6496_s1 + $0x268] sm:$0xff]  }
  0x2f   : > { %4510 = vmatprep.subr.bf16.mxu1 %v5356_v1 }
  0x30   : > { %4407 = vmatmul.mubr.bf16.vlgmr.msra.gmra.mrb[0].mxu0 %v5543_v18 }
  0x31   : > { %4411 = vmatpush3.bf16.msra.mxu0 %v5089_v19  ;;  %4507 = vmatmul.mubr.bf16.vlgmr.msra.gmra.mrb[0].mxu1 %v5543_v18  ;;  %v5149_v19 = vld [vmem:[%s6496_s1 + $0x130] sm:$0xff]  }
  0x32   : > { %4511 = vmatpush3.bf16.msra.mxu1 %v5090_v20  ;;  %4412 = vmatprep.subr.bf16.mxu0 %v5356_v1  ;;  %v5150_v20 = vld [vmem:[%s6496_s1 + $0x270] sm:$0xff]  }
  0x33   : > { %4512 = vmatprep.subr.bf16.mxu1 %v5356_v1  ;;  %4426 = vmatprep.mubr.msk.bf16.mxu0 %vm5357_vm0, %v5356_v1 }
  0x34   : > { %4526 = vmatprep.mubr.msk.bf16.mxu1 %vm5357_vm0, %v5356_v1 }
  0x35   : > { %4413 = vmatpush3.bf16.msra.mxu0 %v5091_v21  ;;  %v5151_v21 = vld [vmem:[%s6496_s1 + $0x138] sm:$0xff]  }
  0x36   : > { %4513 = vmatpush3.bf16.msra.mxu1 %v5092_v22  ;;  %4414 = vmatprep.subr.bf16.mxu0 %v5356_v1  ;;  %v5152_v22 = vld [vmem:[%s6496_s1 + $0x278] sm:$0xff]  }
  0x37   : > { %4514 = vmatprep.subr.bf16.mxu1 %v5356_v1 }
  0x39   : > { %4415 = vmatpush3.bf16.msra.mxu0 %v5093_v23  ;;  %v807_v23 = vld [vmem:[%s5531_s13 + $0x2] sm:$0x3f]  ;;  %s375_s13 = sand.u32 1, %s5346_s18  }
  0x3a   : > { %4515 = vmatpush3.bf16.msra.mxu1 %v5094_v24  ;;  %4416 = vmatprep.subr.bf16.mxu0 %v5356_v1  ;;  %v5153_v24 = vld [vmem:[%s6496_s1 + $0x2c0] sm:$0xff]   ;;  %s376_s16 = scalar_lea.vmem [#allocation2], %s375_s13  ;;  %s3503_s30 = scalar_lea.sflag [#allocation3], %s375_s13 }
  0x3b   : > { %4516 = vmatprep.subr.bf16.mxu1 %v5356_v1  ;;  %s3515_s22 = sshll.u32 %s376_s16, 4  ;;  %s6455_s22 = int_to_ptr.vmem [resolvable:$true] %s3515_s22 }
  0x3c   : > { %s5292_s12 = scalar_lea.vmem %s6455_s22, 16  ;;  %p5299_p0 = scmp.lt.s32.totalorder %s6455_s22, %s5297_s29 }
  0x3d   : > { %4417 = vmatpush3.bf16.msra.mxu0 %v5095_v25  ;;  %v5832_v25 = vpack.c.bf16 %v807_v23, %v807_v23  ;;  %v5214_v23 = vld [vmem:[%s6496_s1 + $0x4b0] sm:$0xff]   ;;  %p5293_p11 = scmp.ne.s32.totalorder %s6455_s22, %s5292_s12  ;;  %p5300_p1 = scmp.lt.s32.totalorder %s5298_s0, %s5292_s12 }
  0x3e   : > { %4517 = vmatpush3.bf16.msra.mxu1 %v5096_v26  ;;  %4418 = vmatprep.subr.bf16.mxu0 %v5356_v1  ;;  %v5154_v26 = vld [vmem:[%s6496_s1 + $0x400] sm:$0xff]  }
  0x3f   : > { %4518 = vmatprep.subr.bf16.mxu1 %v5356_v1  ;;  %p5294_p12 = pnand %p5293_p11, %p5457_p5  ;;  %p5301_p2 = por %p5300_p1, %p5299_p0 }
  0x41   : > { %4419 = vmatpush3.bf16.msra.mxu0 %v5097_v27  ;;  %v5155_v27 = vld [vmem:[%s6496_s1 + $0x2c8] sm:$0xff]   ;;  %p5295_p13 = pneg %p5294_p12 }
  0x42   : > { %4519 = vmatpush3.bf16.msra.mxu1 %v5098_v28  ;;  %4420 = vmatprep.subr.bf16.mxu0 %v5356_v1  ;;  %v5156_v28 = vld [vmem:[%s6496_s1 + $0x408] sm:$0xff]  }
  0x43   : > { %4520 = vmatprep.subr.bf16.mxu1 %v5356_v1  ;;  %p5302_p3 = pnand %p5301_p2, %p5295_p13 }
  0x45   : > { %4421 = vmatpush3.bf16.msra.mxu0 %v5099_v29  ;;  %v5157_v29 = vld [vmem:[%s6496_s1 + $0x2d0] sm:$0xff]  }
  0x46   : > { %4521 = vmatpush3.bf16.msra.mxu1 %v5100_v30  ;;  %4422 = vmatprep.subr.bf16.mxu0 %v5356_v1  ;;  %v5158_v30 = vld [vmem:[%s6496_s1 + $0x410] sm:$0xff]  }
  0x47   : > { %4522 = vmatprep.subr.bf16.mxu1 %v5356_v1 }
  0x49   : > { %4423 = vmatpush3.bf16.msra.mxu0 %v5101_v31  ;;  %v5159_v31 = vld [vmem:[%s6496_s1 + $0x2d8] sm:$0xff]  }
  0x4a   : > { %4523 = vmatpush3.bf16.msra.mxu1 %v5102_v32  ;;  %4424 = vmatprep.subr.bf16.mxu0 %v5356_v1  ;;  %v5160_v32 = vld [vmem:[%s6496_s1 + $0x418] sm:$0xff]  }
  0x4b   : > { %4524 = vmatprep.subr.bf16.mxu1 %v5356_v1 }
  0x4d   : > { %4425 = vmatpush3.bf16.msra.mxu0 %v5103_v33  ;;  %v5161_v33 = vld [vmem:[%s6496_s1 + $0x2e0] sm:$0xff]  }
  0x4e   : > { %4525 = vmatpush3.bf16.msra.mxu1 %v5104_v34  ;;  %4430 = vmatprep.subr.bf16.mxu0 %v5356_v1  ;;  %v5162_v34 = vld [vmem:[%s6496_s1 + $0x420] sm:$0xff]  }
  0x4f   : > { %4530 = vmatprep.subr.bf16.mxu1 %v5356_v1 }
  0x50   : > { %4427 = vmatmul.mubr.bf16.vlgmr.msra.gmra.mrb[0].mxu0 %v5543_v18 }
  0x51   : > { %4431 = vmatpush3.bf16.msra.mxu0 %v5105_v35  ;;  %4527 = vmatmul.mubr.bf16.vlgmr.msra.gmra.mrb[0].mxu1 %v5543_v18  ;;  %v5163_v35 = vld [vmem:[%s6496_s1 + $0x2e8] sm:$0xff]  }
  0x52   : > { %4531 = vmatpush3.bf16.msra.mxu1 %v5106_v36  ;;  %4432 = vmatprep.subr.bf16.mxu0 %v5356_v1  ;;  %v5164_v36 = vld [vmem:[%s6496_s1 + $0x428] sm:$0xff]  }
  0x53   : > { %4532 = vmatprep.subr.bf16.mxu1 %v5356_v1  ;;  %4446 = vmatprep.mubr.msk.bf16.mxu0 %vm5357_vm0, %v5356_v1 }
  0x54   : > { %4546 = vmatprep.mubr.msk.bf16.mxu1 %vm5357_vm0, %v5356_v1 }
  0x55   : > { %4433 = vmatpush3.bf16.msra.mxu0 %v5107_v37  ;;  %v5165_v37 = vld [vmem:[%s6496_s1 + $0x2f0] sm:$0xff]  }
  0x56   : > { %4533 = vmatpush3.bf16.msra.mxu1 %v5108_v38  ;;  %4434 = vmatprep.subr.bf16.mxu0 %v5356_v1  ;;  %v5166_v38 = vld [vmem:[%s6496_s1 + $0x430] sm:$0xff]  }
  0x57   : > { %4534 = vmatprep.subr.bf16.mxu1 %v5356_v1 }
  0x59   : > { %4435 = vmatpush3.bf16.msra.mxu0 %v5109_v39  ;;  %v5167_v39 = vld [vmem:[%s6496_s1 + $0x2f8] sm:$0xff]  }
  0x5a   : > { %4535 = vmatpush3.bf16.msra.mxu1 %v5110_v40  ;;  %4436 = vmatprep.subr.bf16.mxu0 %v5356_v1  ;;  %v5168_v40 = vld [vmem:[%s6496_s1 + $0x438] sm:$0xff]  }
  0x5b   : > { %4536 = vmatprep.subr.bf16.mxu1 %v5356_v1 }
  0x5d   : > { %4437 = vmatpush3.bf16.msra.mxu0 %v5111_v41  ;;  %v5169_v41 = vld [vmem:[%s6496_s1 + $0x280] sm:$0xff]  }
  0x5e   : > { %4537 = vmatpush3.bf16.msra.mxu1 %v5112_v42  ;;  %4438 = vmatprep.subr.bf16.mxu0 %v5356_v1  ;;  %v5170_v42 = vld [vmem:[%s6496_s1 + $0x3c0] sm:$0xff]  }
  0x5f   : > { %4538 = vmatprep.subr.bf16.mxu1 %v5356_v1 }
  0x61   : > { %4439 = vmatpush3.bf16.msra.mxu0 %v5113_v43  ;;  %v5171_v43 = vld [vmem:[%s6496_s1 + $0x288] sm:$0xff]  }
  0x62   : > { %4539 = vmatpush3.bf16.msra.mxu1 %v5114_v44  ;;  %4440 = vmatprep.subr.bf16.mxu0 %v5356_v1  ;;  %v5172_v44 = vld [vmem:[%s6496_s1 + $0x3c8] sm:$0xff]  }
  0x63   : > { %4540 = vmatprep.subr.bf16.mxu1 %v5356_v1 }
  0x65   : > { %4441 = vmatpush3.bf16.msra.mxu0 %v5115_v45  ;;  %v5173_v45 = vld [vmem:[%s6496_s1 + $0x290] sm:$0xff]  }
  0x66   : > { %4541 = vmatpush3.bf16.msra.mxu1 %v5116_v46  ;;  %4442 = vmatprep.subr.bf16.mxu0 %v5356_v1  ;;  %v5174_v46 = vld [vmem:[%s6496_s1 + $0x3d0] sm:$0xff]  }
  0x67   : > { %4542 = vmatprep.subr.bf16.mxu1 %v5356_v1 }
  0x69   : > { %4443 = vmatpush3.bf16.msra.mxu0 %v5117_v47  ;;  %v5175_v47 = vld [vmem:[%s6496_s1 + $0x298] sm:$0xff]  }
  0x6a   : > { %4543 = vmatpush3.bf16.msra.mxu1 %v5118_v48  ;;  %4444 = vmatprep.subr.bf16.mxu0 %v5356_v1  ;;  %v5176_v48 = vld [vmem:[%s6496_s1 + $0x3d8] sm:$0xff]  }
  0x6b   : > { %4544 = vmatprep.subr.bf16.mxu1 %v5356_v1 }
  0x6d   : > { %4445 = vmatpush3.bf16.msra.mxu0 %v5119_v50  ;;  %v5178_v50 = vld [vmem:[%s6496_s1 + $0x3e0] sm:$0xff]  }
  0x6e   : > { %4545 = vmatpush3.bf16.msra.mxu1 %v5120_v51  ;;  %4450 = vmatprep.subr.bf16.mxu0 %v5356_v1  ;;  %v5179_v51 = vld [vmem:[%s6496_s1 + $0x2a8] sm:$0xff]  }
  0x6f   : > { %4550 = vmatprep.subr.bf16.mxu1 %v5356_v1 }
  0x70   : > { %4447 = vmatmul.mubr.bf16.vlgmr.msra.gmra.mrb[0].mxu0 %v5686_v52 }
  0x71   : > { %4451 = vmatpush3.bf16.msra.mxu0 %v5121_v53  ;;  %4547 = vmatmul.mubr.bf16.vlgmr.msra.gmra.mrb[0].mxu1 %v5686_v52  ;;  %v5180_v53 = vld [vmem:[%s6496_s1 + $0x3e8] sm:$0xff]  }
  0x72   : > { %4551 = vmatpush3.bf16.msra.mxu1 %v5122_v54  ;;  %4452 = vmatprep.subr.bf16.mxu0 %v5356_v1  ;;  %v5181_v54 = vld [vmem:[%s6496_s1 + $0x2b0] sm:$0xff]  }
  0x73   : > { %4552 = vmatprep.subr.bf16.mxu1 %v5356_v1  ;;  %4466 = vmatprep.mubr.msk.bf16.mxu0 %vm5357_vm0, %v5356_v1 }
  0x74   : > { %4566 = vmatprep.mubr.msk.bf16.mxu1 %vm5357_vm0, %v5356_v1 }
  0x75   : > { %4453 = vmatpush3.bf16.msra.mxu0 %v5123_v55  ;;  %v5182_v55 = vld [vmem:[%s6496_s1 + $0x3f0] sm:$0xff]  }
  0x76   : > { %4553 = vmatpush3.bf16.msra.mxu1 %v5124_v56  ;;  %4454 = vmatprep.subr.bf16.mxu0 %v5356_v1  ;;  %v5183_v56 = vld [vmem:[%s6496_s1 + $0x2b8] sm:$0xff]  }
  0x77   : > { %4554 = vmatprep.subr.bf16.mxu1 %v5356_v1 }
  0x79   : > { %4455 = vmatpush3.bf16.msra.mxu0 %v5125_v57  ;;  %v5184_v57 = vld [vmem:[%s6496_s1 + $0x3f8] sm:$0xff]  }
  0x7a   : > { %4555 = vmatpush3.bf16.msra.mxu1 %v5126_v58  ;;  %4456 = vmatprep.subr.bf16.mxu0 %v5356_v1  ;;  %v5185_v58 = vld [vmem:[%s6496_s1 + $0x300] sm:$0xff]  }
  0x7b   : > { %4556 = vmatprep.subr.bf16.mxu1 %v5356_v1 }
  0x7d   : > { %4457 = vmatpush3.bf16.msra.mxu0 %v5127_v59  ;;  %v5186_v59 = vld [vmem:[%s6496_s1 + $0x440] sm:$0xff]  }
  0x7e   : > { %4557 = vmatpush3.bf16.msra.mxu1 %v5128_v60  ;;  %4458 = vmatprep.subr.bf16.mxu0 %v5356_v1  ;;  %v5187_v60 = vld [vmem:[%s6496_s1 + $0x308] sm:$0xff]  }
  0x7f   : > { %4558 = vmatprep.subr.bf16.mxu1 %v5356_v1 }
  0x81   : > { %4459 = vmatpush3.bf16.msra.mxu0 %v5129_v61  ;;  %v5188_v61 = vld [vmem:[%s6496_s1 + $0x448] sm:$0xff]  }
  0x82   : > { %4559 = vmatpush3.bf16.msra.mxu1 %v5130_v62  ;;  %4460 = vmatprep.subr.bf16.mxu0 %v5356_v1  ;;  %v5190_v62 = vld [vmem:[%s6496_s1 + $0x450] sm:$0xff]  }
  0x83   : > { %4560 = vmatprep.subr.bf16.mxu1 %v5356_v1 }
  0x85   : > { %4461 = vmatpush3.bf16.msra.mxu0 %v5131_v63  ;;  %v5191_v63 = vld [vmem:[%s6496_s1 + $0x318] sm:$0xff]  }
  0x86   : > { %4561 = vmatpush3.bf16.msra.mxu1 %v5132_v0  ;;  %4462 = vmatprep.subr.bf16.mxu0 %v5356_v1  ;;  %v5192_v0 = vld [vmem:[%s6496_s1 + $0x458] sm:$0xff]  }
  0x87   : > { %4562 = vmatprep.subr.bf16.mxu1 %v5356_v1 }
  0x89   : > { %4463 = vmatpush3.bf16.msra.mxu0 %v5133_v2  ;;  %v5193_v2 = vld [vmem:[%s6496_s1 + $0x320] sm:$0xff]  }
  0x8a   : > { %4563 = vmatpush3.bf16.msra.mxu1 %v5134_v3  ;;  %4464 = vmatprep.subr.bf16.mxu0 %v5356_v1  ;;  %v5194_v3 = vld [vmem:[%s6496_s1 + $0x460] sm:$0xff]  }
  0x8b   : > { %4564 = vmatprep.subr.bf16.mxu1 %v5356_v1 }
  0x8d   : > { %4465 = vmatpush3.bf16.msra.mxu0 %v5135_v4  ;;  %v5195_v4 = vld [vmem:[%s6496_s1 + $0x328] sm:$0xff]  }
  0x8e   : > { %4565 = vmatpush3.bf16.msra.mxu1 %v5136_v5  ;;  %4470 = vmatprep.subr.bf16.mxu0 %v5356_v1  ;;  %v5196_v5 = vld [vmem:[%s6496_s1 + $0x468] sm:$0xff]  }
  0x8f   : > { %4570 = vmatprep.subr.bf16.mxu1 %v5356_v1 }
  0x90   : > { %4467 = vmatmul.mubr.bf16.vlgmr.msra.gmra.mrb[0].mxu0 %v5686_v52 }
  0x91   : > { %4471 = vmatpush3.bf16.msra.mxu0 %v5137_v6  ;;  %4567 = vmatmul.mubr.bf16.vlgmr.msra.gmra.mrb[0].mxu1 %v5686_v52  ;;  %v5197_v6 = vld [vmem:[%s6496_s1 + $0x330] sm:$0xff]  }
  0x92   : > { %4571 = vmatpush3.bf16.msra.mxu1 %v5138_v7  ;;  %4472 = vmatprep.subr.bf16.mxu0 %v5356_v1  ;;  %v5198_v7 = vld [vmem:[%s6496_s1 + $0x470] sm:$0xff]  }
  0x93   : > { %4572 = vmatprep.subr.bf16.mxu1 %v5356_v1  ;;  %4486 = vmatprep.mubr.msk.bf16.mxu0 %vm5357_vm0, %v5356_v1 }
  0x94   : > { %4586 = vmatprep.mubr.msk.bf16.mxu1 %vm5357_vm0, %v5356_v1 }
  0x95   : > { %4473 = vmatpush3.bf16.msra.mxu0 %v5139_v8  ;;  %v5199_v8 = vld [vmem:[%s6496_s1 + $0x338] sm:$0xff]  }
  0x96   : > { %4573 = vmatpush3.bf16.msra.mxu1 %v5140_v9  ;;  %4474 = vmatprep.subr.bf16.mxu0 %v5356_v1  ;;  %v5200_v9 = vld [vmem:[%s6496_s1 + $0x478] sm:$0xff]  }
  0x97   : > { %4574 = vmatprep.subr.bf16.mxu1 %v5356_v1 }
  0x99   : > { %4475 = vmatpush3.bf16.msra.mxu0 %v5141_v10  ;;  %v5201_v10 = vld [vmem:[%s6496_s1 + $0x340] sm:$0xff]  }
  0x9a   : > { %4575 = vmatpush3.bf16.msra.mxu1 %v5142_v11  ;;  %4476 = vmatprep.subr.bf16.mxu0 %v5356_v1  ;;  %v5202_v11 = vld [vmem:[%s6496_s1 + $0x480] sm:$0xff]  }
  0x9b   : > { %4576 = vmatprep.subr.bf16.mxu1 %v5356_v1 }
  0x9d   : > { %4477 = vmatpush3.bf16.msra.mxu0 %v5143_v12  ;;  %v5203_v12 = vld [vmem:[%s6496_s1 + $0x348] sm:$0xff]  }
  0x9e   : > { %4577 = vmatpush3.bf16.msra.mxu1 %v5144_v13  ;;  %4478 = vmatprep.subr.bf16.mxu0 %v5356_v1  ;;  %v5204_v13 = vld [vmem:[%s6496_s1 + $0x488] sm:$0xff]  }
  0x9f   : > { %4578 = vmatprep.subr.bf16.mxu1 %v5356_v1 }
  0xa1   : > { %4479 = vmatpush3.bf16.msra.mxu0 %v5145_v14  ;;  %v5206_v14 = vld [vmem:[%s6496_s1 + $0x490] sm:$0xff]  }
  0xa2   : > { %4579 = vmatpush3.bf16.msra.mxu1 %v5146_v15  ;;  %4480 = vmatprep.subr.bf16.mxu0 %v5356_v1  ;;  %v5207_v15 = vld [vmem:[%s6496_s1 + $0x358] sm:$0xff]  }
  0xa3   : > { %4580 = vmatprep.subr.bf16.mxu1 %v5356_v1 }
  0xa5   : > { %4481 = vmatpush3.bf16.msra.mxu0 %v5147_v16  ;;  %v5208_v16 = vld [vmem:[%s6496_s1 + $0x498] sm:$0xff]  }
  0xa6   : > { %4581 = vmatpush3.bf16.msra.mxu1 %v5148_v17  ;;  %4482 = vmatprep.subr.bf16.mxu0 %v5356_v1  ;;  %v5209_v17 = vld [vmem:[%s6496_s1 + $0x360] sm:$0xff]  }
  0xa7   : > { %4582 = vmatprep.subr.bf16.mxu1 %v5356_v1 }
  0xa9   : > { %4483 = vmatpush3.bf16.msra.mxu0 %v5149_v19  ;;  %v5210_v19 = vld [vmem:[%s6496_s1 + $0x4a0] sm:$0xff]  }
  0xaa   : > { %4583 = vmatpush3.bf16.msra.mxu1 %v5150_v20  ;;  %4484 = vmatprep.subr.bf16.mxu0 %v5356_v1  ;;  %v5211_v20 = vld [vmem:[%s6496_s1 + $0x368] sm:$0xff]  }
  0xab   : > { %4584 = vmatprep.subr.bf16.mxu1 %v5356_v1 }
  0xad   : > { %4485 = vmatpush3.bf16.msra.mxu0 %v5151_v21  ;;  %v5212_v21 = vld [vmem:[%s6496_s1 + $0x4a8] sm:$0xff]  }
  0xae   : > { %4585 = vmatpush3.bf16.msra.mxu1 %v5152_v22  ;;  %4590 = vmatprep.subr.bf16.mxu0 %v5356_v1  ;;  %v5213_v22 = vld [vmem:[%s6496_s1 + $0x370] sm:$0xff]  }
  0xaf   : > { %4690 = vmatprep.subr.bf16.mxu1 %v5356_v1 }
  0xb0   : > { %4487 = vmatmul.mubr.bf16.vlgmr.msra.gmra.mrb[0].mxu0 %v5832_v25 }
  0xb1   : > { %4587 = vmatmul.mubr.bf16.vlgmr.msra.gmra.mrb[0].mxu1 %v5832_v25  ;;  %4591 = vmatpush3.bf16.msra.mxu0 %v5153_v24  ;;  %v5215_v24 = vld [vmem:[%s6496_s1 + $0x378] sm:$0xff]  }
  0xb2   : > { %4691 = vmatpush3.bf16.msra.mxu1 %v5154_v26  ;;  %4592 = vmatprep.subr.bf16.mxu0 %v5356_v1  ;;  %v5216_v26 = vld [vmem:[%s6496_s1 + $0x4b8] sm:$0xff]  }
  0xb3   : > { %4692 = vmatprep.subr.bf16.mxu1 %v5356_v1  ;;  %4606 = vmatprep.mubr.msk.bf16.mxu0 %vm5357_vm0, %v5356_v1 }
  0xb4   : > { %4706 = vmatprep.mubr.msk.bf16.mxu1 %vm5357_vm0, %v5356_v1 }
  0xb5   : > { %4593 = vmatpush3.bf16.msra.mxu0 %v5155_v27  ;;  %v5217_v27 = vld [vmem:[%s6496_s1 + $0x380] sm:$0xff]  }
  0xb6   : > { %4693 = vmatpush3.bf16.msra.mxu1 %v5156_v28  ;;  %4594 = vmatprep.subr.bf16.mxu0 %v5356_v1  ;;  %v5218_v28 = vld [vmem:[%s6496_s1 + $0x4c0] sm:$0xff]  }
  0xb7   : > { %4694 = vmatprep.subr.bf16.mxu1 %v5356_v1 }
  0xb9   : > { %4595 = vmatpush3.bf16.msra.mxu0 %v5157_v29  ;;  %v5219_v29 = vld [vmem:[%s6496_s1 + $0x388] sm:$0xff]  }
  0xba   : > { %4695 = vmatpush3.bf16.msra.mxu1 %v5158_v30  ;;  %4596 = vmatprep.subr.bf16.mxu0 %v5356_v1  ;;  %v5220_v30 = vld [vmem:[%s6496_s1 + $0x4c8] sm:$0xff]  }
  0xbb   : > { %4696 = vmatprep.subr.bf16.mxu1 %v5356_v1 }
  0xbd   : > { %4597 = vmatpush3.bf16.msra.mxu0 %v5159_v31  ;;  %v5221_v31 = vld [vmem:[%s6496_s1 + $0x390] sm:$0xff]  }
  0xbe   : > { %4697 = vmatpush3.bf16.msra.mxu1 %v5160_v32  ;;  %4598 = vmatprep.subr.bf16.mxu0 %v5356_v1  ;;  %v5222_v32 = vld [vmem:[%s6496_s1 + $0x4d0] sm:$0xff]  }
  0xbf   : > { %4698 = vmatprep.subr.bf16.mxu1 %v5356_v1 }
  0xc1   : > { %4599 = vmatpush3.bf16.msra.mxu0 %v5161_v33  ;;  %v5223_v33 = vld [vmem:[%s6496_s1 + $0x398] sm:$0xff]  }
  0xc2   : > { %4699 = vmatpush3.bf16.msra.mxu1 %v5162_v34  ;;  %4600 = vmatprep.subr.bf16.mxu0 %v5356_v1  ;;  %v5224_v34 = vld [vmem:[%s6496_s1 + $0x4d8] sm:$0xff]  }
  0xc3   : > { %4700 = vmatprep.subr.bf16.mxu1 %v5356_v1 }
  0xc5   : > { %4601 = vmatpush3.bf16.msra.mxu0 %v5163_v35  ;;  %v5225_v35 = vld [vmem:[%s6496_s1 + $0x3a0] sm:$0xff]  }
  0xc6   : > { %4701 = vmatpush3.bf16.msra.mxu1 %v5164_v36  ;;  %4602 = vmatprep.subr.bf16.mxu0 %v5356_v1  ;;  %v5226_v36 = vld [vmem:[%s6496_s1 + $0x4e0] sm:$0xff]  }
  0xc7   : > { %4702 = vmatprep.subr.bf16.mxu1 %v5356_v1 }
  0xc9   : > { %4603 = vmatpush3.bf16.msra.mxu0 %v5165_v37  ;;  %v5227_v37 = vld [vmem:[%s6496_s1 + $0x3a8] sm:$0xff]  }
  0xca   : > { %4703 = vmatpush3.bf16.msra.mxu1 %v5166_v38  ;;  %4604 = vmatprep.subr.bf16.mxu0 %v5356_v1  ;;  %v5228_v38 = vld [vmem:[%s6496_s1 + $0x4e8] sm:$0xff]  }
  0xcb   : > { %4704 = vmatprep.subr.bf16.mxu1 %v5356_v1 }
  0xcd   : > { %4605 = vmatpush3.bf16.msra.mxu0 %v5167_v39  ;;  %v5229_v39 = vld [vmem:[%s6496_s1 + $0x3b0] sm:$0xff]  }
  0xce   : > { %4705 = vmatpush3.bf16.msra.mxu1 %v5168_v40  ;;  %4610 = vmatprep.subr.bf16.mxu0 %v5356_v1  ;;  %v5230_v40 = vld [vmem:[%s6496_s1 + $0x4f0] sm:$0xff]  }
  0xcf   : > { %4710 = vmatprep.subr.bf16.mxu1 %v5356_v1 }
  0xd0   : > { %4607 = vmatmul.mubr.bf16.vlgmr.msra.gmra.mrb[4].mxu0 %v5686_v52 }
  0xd1   : > { %4611 = vmatpush3.bf16.msra.mxu0 %v5169_v41  ;;  %4707 = vmatmul.mubr.bf16.vlgmr.msra.gmra.mrb[4].mxu1 %v5686_v52  ;;  %v5231_v41 = vld [vmem:[%s6496_s1 + $0x3b8] sm:$0xff]  }
  0xd2   : > { %4711 = vmatpush3.bf16.msra.mxu1 %v5170_v42  ;;  %4612 = vmatprep.subr.bf16.mxu0 %v5356_v1  ;;  %v5232_v42 = vld [vmem:[%s6496_s1 + $0x4f8] sm:$0xff]  }
  0xd3   : > { %4712 = vmatprep.subr.bf16.mxu1 %v5356_v1  ;;  %4626 = vmatprep.mubr.msk.bf16.mxu0 %vm5357_vm0, %v5356_v1 }
  0xd4   : > { %4726 = vmatprep.mubr.msk.bf16.mxu1 %vm5357_vm0, %v5356_v1 }
  0xd5   : > { %4613 = vmatpush3.bf16.msra.mxu0 %v5171_v43 }
  0xd6   : > { %4713 = vmatpush3.bf16.msra.mxu1 %v5172_v44  ;;  %4614 = vmatprep.subr.bf16.mxu0 %v5356_v1 }
  0xd7   : > { %4714 = vmatprep.subr.bf16.mxu1 %v5356_v1 }
  0xd9   : > { %4615 = vmatpush3.bf16.msra.mxu0 %v5173_v45 }
  0xda   : > { %4715 = vmatpush3.bf16.msra.mxu1 %v5174_v46  ;;  %4616 = vmatprep.subr.bf16.mxu0 %v5356_v1 }
  0xdb   : > { %4716 = vmatprep.subr.bf16.mxu1 %v5356_v1 }
  0xdd   : > { %4617 = vmatpush3.bf16.msra.mxu0 %v5175_v47 }
  0xde   : > { %4717 = vmatpush3.bf16.msra.mxu1 %v5176_v48  ;;  %4618 = vmatprep.subr.bf16.mxu0 %v5356_v1 }
  0xdf   : > { %4718 = vmatprep.subr.bf16.mxu1 %v5356_v1 }
  0xe1   : > { %4619 = vmatpush3.bf16.msra.mxu0 %v5177_v49 }
  0xe2   : > { %4719 = vmatpush3.bf16.msra.mxu1 %v5178_v50  ;;  %4620 = vmatprep.subr.bf16.mxu0 %v5356_v1 }
  0xe3   : > { %4720 = vmatprep.subr.bf16.mxu1 %v5356_v1 }
  0xe5   : > { %4621 = vmatpush3.bf16.msra.mxu0 %v5179_v51 }
  0xe6   : > { %4721 = vmatpush3.bf16.msra.mxu1 %v5180_v53  ;;  %4622 = vmatprep.subr.bf16.mxu0 %v5356_v1  ;;  %v5233_v53 = vld [vmem:[%s6498_s3 + $0x14] sm:$0xff]  }
  0xe7   : > { %4722 = vmatprep.subr.bf16.mxu1 %v5356_v1 }
  0xe9   : > { %4623 = vmatpush3.bf16.msra.mxu0 %v5181_v54  ;;  %v5235_v54 = vld [vmem:[%s6498_s3 + $0x1c] sm:$0xff]  }
  0xea   : > { %4723 = vmatpush3.bf16.msra.mxu1 %v5182_v55  ;;  %4624 = vmatprep.subr.bf16.mxu0 %v5356_v1  ;;  %v5236_v55 = vld [vmem:[%s6498_s3 + $0x80] sm:$0xff]  }
  0xeb   : > { %4724 = vmatprep.subr.bf16.mxu1 %v5356_v1 }
  0xed   : > { %4625 = vmatpush3.bf16.msra.mxu0 %v5183_v56  ;;  %v5237_v56 = vld [vmem:[%s6498_s3 + $0x24] ss:$0 sps:$4 sm:$0x33]  }
  0xee   : > { %4725 = vmatpush3.bf16.msra.mxu1 %v5184_v57  ;;  %4630 = vmatprep.subr.bf16.mxu0 %v5356_v1  ;;  %v5238_v57 = vld [vmem:[%s6498_s3 + $0x88] ss:$0 sps:$4 sm:$0x33]  }
  0xef   : > { %4730 = vmatprep.subr.bf16.mxu1 %v5356_v1 }
  0xf0   : > { %4627 = vmatmul.mubr.bf16.vlgmr.msra.gmra.mrb[4].mxu0 %v5543_v18 }
  0xf1   : > { %4631 = vmatpush3.bf16.msra.mxu0 %v5185_v58  ;;  %4727 = vmatmul.mubr.bf16.vlgmr.msra.gmra.mrb[4].mxu1 %v5543_v18  ;;  %v5189_v18 = vld [vmem:[%s6496_s1 + $0x310] sm:$0xff]   ;;  %v2556_v58 = vsel %vm2554_vm1, %v5237_v56, 0  ;;  %v5263_v56 = vld [vmem:[%s6500_s5] sm:$0xff]  }
  0xf2   : > { %4731 = vmatpush3.bf16.msra.mxu1 %v5186_v59  ;;  %4632 = vmatprep.subr.bf16.mxu0 %v5356_v1  ;;  %v2896_v59 = vsel %vm2554_vm1, %v5238_v57, 0  ;;  %v5264_v57 = vld [vmem:[%s6502_s7] sm:$0xff]  }
  0xf3   : > { %4732 = vmatprep.subr.bf16.mxu1 %v5356_v1  ;;  %4646 = vmatprep.mubr.msk.bf16.mxu0 %vm5357_vm0, %v5356_v1 }
  0xf4   : > { %4746 = vmatprep.mubr.msk.bf16.mxu1 %vm5357_vm0, %v5356_v1 }
  0xf5   : > { %4633 = vmatpush3.bf16.msra.mxu0 %v5187_v60 }
  0xf6   : > { %4733 = vmatpush3.bf16.msra.mxu1 %v5188_v61  ;;  %4634 = vmatprep.subr.bf16.mxu0 %v5356_v1 }
  0xf7   : > { %4734 = vmatprep.subr.bf16.mxu1 %v5356_v1 }
  0xf9   : > { %4635 = vmatpush3.bf16.msra.mxu0 %v5189_v18 }
  0xfa   : > { %4735 = vmatpush3.bf16.msra.mxu1 %v5190_v62  ;;  %4636 = vmatprep.subr.bf16.mxu0 %v5356_v1 }
  0xfb   : > { %4736 = vmatprep.subr.bf16.mxu1 %v5356_v1 }
  0xfd   : > { %4637 = vmatpush3.bf16.msra.mxu0 %v5191_v63  ;;  %v4039_v63 = vld [vmem:[%s6497_s2] ss:$0 sm:$0xff] }
  0xfe   : > { %4737 = vmatpush3.bf16.msra.mxu1 %v5192_v0  ;;  %4638 = vmatprep.subr.bf16.mxu0 %v5356_v1 }
  0xff   : > { %4738 = vmatprep.subr.bf16.mxu1 %v5356_v1 }
 0x101   : > { %4639 = vmatpush3.bf16.msra.mxu0 %v5193_v2 }
 0x102   : > { %4739 = vmatpush3.bf16.msra.mxu1 %v5194_v3  ;;  %4640 = vmatprep.subr.bf16.mxu0 %v5356_v1 }
 0x103   : > { %4740 = vmatprep.subr.bf16.mxu1 %v5356_v1 }
 0x105   : > { %4641 = vmatpush3.bf16.msra.mxu0 %v5195_v4 }
 0x106   : > { %4741 = vmatpush3.bf16.msra.mxu1 %v5196_v5  ;;  %4642 = vmatprep.subr.bf16.mxu0 %v5356_v1 }
 0x107   : > { %4742 = vmatprep.subr.bf16.mxu1 %v5356_v1 }
 0x109   : > { %4643 = vmatpush3.bf16.msra.mxu0 %v5197_v6 }
 0x10a   : > { %4743 = vmatpush3.bf16.msra.mxu1 %v5198_v7  ;;  %4644 = vmatprep.subr.bf16.mxu0 %v5356_v1 }
 0x10b   : > { %4744 = vmatprep.subr.bf16.mxu1 %v5356_v1 }
 0x10d   : > { %4645 = vmatpush3.bf16.msra.mxu0 %v5199_v8 }
 0x10e   : > { %4745 = vmatpush3.bf16.msra.mxu1 %v5200_v9  ;;  %4650 = vmatprep.subr.bf16.mxu0 %v5356_v1 }
 0x10f   : > { %4750 = vmatprep.subr.bf16.mxu1 %v5356_v1 }
 0x110   : > { %4647 = vmatmul.mubr.bf16.vlgmr.msra.gmra.mrb[4].mxu0 %v5686_v52 }
 0x111   : > { %4651 = vmatpush3.bf16.msra.mxu0 %v5201_v10  ;;  %4747 = vmatmul.mubr.bf16.vlgmr.msra.gmra.mrb[4].mxu1 %v5686_v52  ;;  %v5205_v52 = vld [vmem:[%s6496_s1 + $0x350] sm:$0xff]  }
 0x112   : > { %4751 = vmatpush3.bf16.msra.mxu1 %v5202_v11  ;;  %4652 = vmatprep.subr.bf16.mxu0 %v5356_v1 }
 0x113   : > { %4752 = vmatprep.subr.bf16.mxu1 %v5356_v1  ;;  %4666 = vmatprep.mubr.msk.bf16.mxu0 %vm5357_vm0, %v5356_v1 }
 0x114   : > { %4766 = vmatprep.mubr.msk.bf16.mxu1 %vm5357_vm0, %v5356_v1 }
 0x115   : > { %4653 = vmatpush3.bf16.msra.mxu0 %v5203_v12 }
 0x116   : > { %4753 = vmatpush3.bf16.msra.mxu1 %v5204_v13  ;;  %4654 = vmatprep.subr.bf16.mxu0 %v5356_v1 }
 0x117   : > { %4754 = vmatprep.subr.bf16.mxu1 %v5356_v1 }
 0x119   : > { %4655 = vmatpush3.bf16.msra.mxu0 %v5205_v52 }
 0x11a   : > { %4755 = vmatpush3.bf16.msra.mxu1 %v5206_v14  ;;  %4656 = vmatprep.subr.bf16.mxu0 %v5356_v1 }
 0x11b   : > { %4756 = vmatprep.subr.bf16.mxu1 %v5356_v1 }
 0x11d   : > { %4657 = vmatpush3.bf16.msra.mxu0 %v5207_v15 }
 0x11e   : > { %4757 = vmatpush3.bf16.msra.mxu1 %v5208_v16  ;;  %4658 = vmatprep.subr.bf16.mxu0 %v5356_v1  ;;  %v5239_v16 = vld [vmem:[%s6498_s3] sm:$0xff]  }
 0x11f   : > { %4758 = vmatprep.subr.bf16.mxu1 %v5356_v1 }
 0x121   : > { %4659 = vmatpush3.bf16.msra.mxu0 %v5209_v17  ;;  %v5240_v17 = vld [vmem:[%s6498_s3 + $0x64] sm:$0xff]  }
 0x122   : > { %4759 = vmatpush3.bf16.msra.mxu1 %v5210_v19  ;;  %4660 = vmatprep.subr.bf16.mxu0 %v5356_v1 }
 0x123   : > { %4760 = vmatprep.subr.bf16.mxu1 %v5356_v1 }
 0x125   : > { %4661 = vmatpush3.bf16.msra.mxu0 %v5211_v20  ;;  %v5241_v20 = vld [vmem:[%s6498_s3 + $0x8] sm:$0xff]  }
 0x126   : > { %4761 = vmatpush3.bf16.msra.mxu1 %v5212_v21  ;;  %4662 = vmatprep.subr.bf16.mxu0 %v5356_v1  ;;  %v5242_v21 = vld [vmem:[%s6498_s3 + $0x6c] sm:$0xff]  }
 0x127   : > { %4762 = vmatprep.subr.bf16.mxu1 %v5356_v1 }
 0x129   : > { %4663 = vmatpush3.bf16.msra.mxu0 %v5213_v22  ;;  %v5243_v22 = vld [vmem:[%s6498_s3 + $0x10] ss:$0 sps:$4 sm:$0x33]  }
 0x12a   : > { %4763 = vmatpush3.bf16.msra.mxu1 %v5214_v23  ;;  %4664 = vmatprep.subr.bf16.mxu0 %v5356_v1  ;;  %v5244_v23 = vld [vmem:[%s6498_s3 + $0x74] ss:$0 sps:$4 sm:$0x33]  }
 0x12b   : > { %4764 = vmatprep.subr.bf16.mxu1 %v5356_v1 }
 0x12d   : > { %4665 = vmatpush3.bf16.msra.mxu0 %v5215_v24  ;;  %v2616_v24 = vsel %vm2554_vm1, %v5243_v22, 0  ;;  %v3207_v22 = vld [vmem:[%s6501_s6] sm:$0x1] }
 0x12e   : > { %4765 = vmatpush3.bf16.msra.mxu1 %v5216_v26  ;;  %4670 = vmatprep.subr.bf16.mxu0 %v5356_v1  ;;  %v2954_v26 = vsel %vm2554_vm1, %v5244_v23, 0 }
 0x12f   : > { %4770 = vmatprep.subr.bf16.mxu1 %v5356_v1 }
 0x130   : > { %4667 = vmatmul.mubr.bf16.vlgmr.msra.gmra.mrb[4].mxu0 %v5832_v25 }
 0x131   : > { %4671 = vmatpush3.bf16.msra.mxu0 %v5217_v27  ;;  %4767 = vmatmul.mubr.bf16.vlgmr.msra.gmra.mrb[4].mxu1 %v5832_v25  ;;  %v5245_v27 = vld [vmem:[%s6498_s3 + $0x28] sm:$0xff]  }
 0x132   : > { %4771 = vmatpush3.bf16.msra.mxu1 %v5218_v28  ;;  %4672 = vmatprep.subr.bf16.mxu0 %v5356_v1  ;;  %v5246_v28 = vld [vmem:[%s6498_s3 + $0x8c] sm:$0xff]  }
 0x133   : > { %4772 = vmatprep.subr.bf16.mxu1 %v5356_v1  ;;  %4686 = vmatprep.mubr.msk.bf16.mxu0 %vm5357_vm0, %v5356_v1 }
 0x134   : > { %4786 = vmatprep.mubr.msk.bf16.mxu1 %vm5357_vm0, %v5356_v1 }
 0x135   : > { %4673 = vmatpush3.bf16.msra.mxu0 %v5219_v29  ;;  %v5247_v29 = vld [vmem:[%s6498_s3 + $0x30] sm:$0xff]  }
 0x136   : > { %4773 = vmatpush3.bf16.msra.mxu1 %v5220_v30  ;;  %4674 = vmatprep.subr.bf16.mxu0 %v5356_v1  ;;  %v5248_v30 = vld [vmem:[%s6498_s3 + $0x94] sm:$0xff]  }
 0x137   : > { %4774 = vmatprep.subr.bf16.mxu1 %v5356_v1 }
 0x139   : > { %4675 = vmatpush3.bf16.msra.mxu0 %v5221_v31  ;;  %v5249_v31 = vld [vmem:[%s6498_s3 + $0x38] ss:$0 sps:$4 sm:$0x33]  }
 0x13a   : > { %4775 = vmatpush3.bf16.msra.mxu1 %v5222_v32  ;;  %4676 = vmatprep.subr.bf16.mxu0 %v5356_v1  ;;  %v5250_v32 = vld [vmem:[%s6498_s3 + $0x9c] ss:$0 sps:$4 sm:$0x33]  }
 0x13b   : > { %4776 = vmatprep.subr.bf16.mxu1 %v5356_v1 }
 0x13d   : > { %4677 = vmatpush3.bf16.msra.mxu0 %v5223_v33  ;;  %v2685_v33 = vsel %vm2554_vm1, %v5249_v31, 0 }
 0x13e   : > { %4777 = vmatpush3.bf16.msra.mxu1 %v5224_v34  ;;  %4678 = vmatprep.subr.bf16.mxu0 %v5356_v1  ;;  %v3018_v34 = vsel %vm2554_vm1, %v5250_v32, 0 }
 0x13f   : > { %4778 = vmatprep.subr.bf16.mxu1 %v5356_v1 }
 0x141   : > { %4679 = vmatpush3.bf16.msra.mxu0 %v5225_v35  ;;  %v5251_v35 = vld [vmem:[%s6498_s3 + $0x3c] sm:$0xff]  }
 0x142   : > { %4779 = vmatpush3.bf16.msra.mxu1 %v5226_v36  ;;  %4680 = vmatprep.subr.bf16.mxu0 %v5356_v1  ;;  %v5252_v36 = vld [vmem:[%s6498_s3 + $0xa0] sm:$0xff]  }
 0x143   : > { %4780 = vmatprep.subr.bf16.mxu1 %v5356_v1 }
 0x145   : > { %4681 = vmatpush3.bf16.msra.mxu0 %v5227_v37 }
 0x146   : > { %4781 = vmatpush3.bf16.msra.mxu1 %v5228_v38  ;;  %4682 = vmatprep.subr.bf16.mxu0 %v5356_v1  ;;  %v5253_v38 = vld [vmem:[%s6498_s3 + $0x44] sm:$0xff]  }
 0x147   : > { %4782 = vmatprep.subr.bf16.mxu1 %v5356_v1 }
 0x149   : > { %4683 = vmatpush3.bf16.msra.mxu0 %v5229_v39  ;;  %v5254_v39 = vld [vmem:[%s6498_s3 + $0xa8] sm:$0xff]  }
 0x14a   : > { %4783 = vmatpush3.bf16.msra.mxu1 %v5230_v40  ;;  %4684 = vmatprep.subr.bf16.mxu0 %v5356_v1  ;;  %v5255_v40 = vld [vmem:[%s6498_s3 + $0x4c] ss:$0 sps:$4 sm:$0x33]  }
 0x14b   : > { %4784 = vmatprep.subr.bf16.mxu1 %v5356_v1 }
 0x14d   : > { %4685 = vmatpush3.bf16.msra.mxu0 %v5231_v41  ;;  %v5256_v41 = vld [vmem:[%s6498_s3 + $0xb0] ss:$0 sps:$4 sm:$0x33]  }
 0x14e   : > { %4785 = vmatpush3.bf16.msra.mxu1 %v5232_v42  ;;  %4790 = vmatprep.subr.bf16.mxu0 %v5356_v1  ;;  %v2756_v42 = vsel %vm2554_vm1, %v5255_v40, 0  ;;  %v5279_v40 = vld [vmem:[%s6504_s9 + $0x38] sm:$0xff]  }
 0x14f   : > { %4840 = vmatprep.subr.bf16.mxu1 %v5356_v1 }
 0x150   : > { %4687 = vmatmul.mubr.bf16.vlgmr.msra.gmra.mrb[4].mxu0 %v5832_v25 }
 0x151   : > { %4787 = vmatmul.mubr.bf16.vlgmr.msra.gmra.mrb[4].mxu1 %v5832_v25  ;;  %4796 = vmatprep.mubr.msk.bf16.mxu0 %vm5357_vm0, %v5356_v1  ;;  %v5234_v25 = vld [vmem:[%s6498_s3 + $0x78] sm:$0xff]  }
 0x152   : > { %4846 = vmatprep.mubr.msk.bf16.mxu1 %vm5357_vm0, %v5356_v1  ;;  %4791 = vmatpush3.bf16.msra.mxu0 %v5233_v53  ;;  %v5262_v53 = vld [vmem:[%s6498_s3 + $0xc4] ss:$0 sps:$4 sm:$0x33]  }
 0x153   : > { %4841 = vmatpush3.bf16.msra.mxu1 %v5234_v25  ;;  %4792 = vmatprep.subr.bf16.mxu0 %v5356_v1 }
 0x154   : > { %4842 = vmatprep.subr.bf16.mxu1 %v5356_v1 }
 0x156   : > { %4793 = vmatpush3.bf16.msra.mxu0 %v5235_v54  ;;  %v3148_v54 = vsel %vm2554_vm1, %v5262_v53, 0  ;;  %v3482_v53 = vlaneseq }
 0x157   : > { %4843 = vmatpush3.bf16.msra.mxu1 %v5236_v55  ;;  %4794 = vmatprep.subr.bf16.mxu0 %v5356_v1 }
 0x158   : > { %4844 = vmatprep.subr.bf16.mxu1 %v5356_v1 }
 0x15a   : > { %4795 = vmatpush3.bf16.msra.mxu0 %v2556_v58  ;;  %v5265_v58 = vld [vmem:[%s6502_s7 + $0x8] sm:$0xff]  }
 0x15b   : > { %4845 = vmatpush3.bf16.msra.mxu1 %v2896_v59  ;;  %4800 = vmatprep.subr.bf16.mxu0 %v5356_v1 }
 0x15c   : > { %4850 = vmatprep.subr.bf16.mxu1 %v5356_v1 }
 0x183   : > { %v908_v43 = vpop.f32.mrb[0].mxu0 }
 0x184   : > { %v1436_v44 = vpop.f32.mrb[0].mxu1  ;;  %v4488_v45 = vpop.f32.mrb[1].mxu0 }
 0x185   : > { %v1443_v46 = vmax.f32 %v908_v43, %v1436_v44  ;;  %v4588_v47 = vpop.f32.mrb[1].mxu1  ;;  %v911_v48 = vpop.f32.mrb[2].mxu0  ;;  %v3083_v43 = vsel %vm2554_vm1, %v5256_v41, 0  ;;  %v3281_v41 = vld [vmem:[%s6503_s8] sm:$0x1] }
 0x186   : > { %v1439_v49 = vpop.f32.mrb[2].mxu1  ;;  %v4489_v50 = vpop.f32.mrb[3].mxu0  ;;  %v5258_v47 = vld [vmem:[%s6498_s3 + $0xb4] sm:$0xff]  }
 0x187   : > { %v4589_v51 = vpop.f32.mrb[3].mxu1  ;;  %v5259_v49 = vld [vmem:[%s6498_s3 + $0x58] sm:$0xff]  }
 0x188   : > { %v5260_v50 = vld [vmem:[%s6498_s3 + $0xbc] sm:$0xff]  }
 0x189   : > { %v5261_v51 = vld [vmem:[%s6498_s3 + $0x60] ss:$0 sps:$4 sm:$0x33]  }
 0x18a   : > { %v2825_v25 = vsel %vm2554_vm1, %v5261_v51, 0 }
 0x223   : > { %v1965_v60 = vpop.f32.mrb[4].mxu0 }
 0x224   : > { %v1972_v61 = vmax.f32 %v1443_v46, %v1965_v60  ;;  %v2494_v18 = vpop.f32.mrb[4].mxu1  ;;  %v4688_v62 = vpop.f32.mrb[5].mxu0  ;;  %v5257_v46 = vld [vmem:[%s6498_s3 + $0x50] sm:$0xff]  }
 0x225   : > { %v4788_v0 = vpop.f32.mrb[5].mxu1  ;;  %v1968_v2 = vpop.f32.mrb[6].mxu0 }
 0x226   : > { %v2501_v3 = vmax.f32 %v1972_v61, %v2494_v18  ;;  %v2497_v4 = vpop.f32.mrb[6].mxu1  ;;  %v4689_v5 = vpop.f32.mrb[7].mxu0 }
 0x227   : > { %v4789_v6 = vpop.f32.mrb[7].mxu1  ;;  %v3196_v5 = vld [vmem:[%s6499_s4] sm:$0x1] }
 0x228   : > { %v2509_v7 = vadd.f32 %v4039_v63, %v2501_v3 }
 0x22a   : > { %v2511_v8 = vmin.f32 %v2509_v7, 0.0  ;;  %vm2510_vm2 = vcmp.gt.f32.partialorder %v2509_v7, 0.0 }
 0x22c   : > { %v2512_v9 = vmul.f32 1.442695, %v2511_v8 }
 0x22e   : > { %5280 = vpow2.f32 %v2512_v9 }
 0x238   : > { %v5281_v10 = vpop.eup %5280 }
 0x239   : > { %v4040_v11 = vadd.f32 -1.0, %v5281_v10 }
 0x23b   : > { %v2515_v12 = vsel %vm2510_vm2, %v2509_v7, %v4040_v11 }
 0x23c   : > { %v6218_v13 = vpack.c.bf16 %v2515_v12, %v2515_v12 }
 0x23e   : > { %v2531_v52 = vshll.u32 %v6218_v13, 16  ;;  %v2529_v14 = vshrl.u32 %v6218_v13, 16  ;;  %v2665_v37 = vrot.slane %v6218_v13, 1  ;;  %v2805_v55 = vrot.slane %v6218_v13, 2 }
 0x240   : > { %v2533_v15 = vrot.slane %v2531_v52, 1  ;;  %v2734_v44 = vrot.slane %v2529_v14, 1  ;;  %v2735_v45 = vrot.slane %v2531_v52, 2  ;;  %v5266_v52 = vld [vmem:[%s6502_s7 + $0x10] sm:$0xff]  }
 0x242   : > { %v2534_v19 = vor.u32 %v2533_v15, %v2529_v14  ;;  %v2736_v48 = vor.u32 %v2735_v45, %v2734_v44  ;;  %v5267_v14 = vld [vmem:[%s6502_s7 + $0x18] sm:$0xff]   ;;  %v5268_v15 = vld [vmem:[%s6502_s7 + $0x20] sm:$0xff]  }
 0x244   : > { %4797 = vmatmul.mubr.msk.bf16.vlgmr.msra.gmra.mrb[8].mxu0 %vm2550_vm3, %v2534_v19  ;;  %4847 = vmatmul.mubr.msk.bf16.vlgmr.msra.gmra.mrb[8].mxu1 %vm2550_vm3, %v2534_v19  ;;  %v5271_v19 = vld [vmem:[%s6502_s7 + $0x38] sm:$0xff]  }
 0x245   : > { %4801 = vmatpush3.bf16.msra.mxu0 %v5239_v16  ;;  %4851 = vmatpush3.bf16.msra.mxu1 %v5240_v17  ;;  %v5269_v16 = vld [vmem:[%s6502_s7 + $0x28] sm:$0xff]   ;;  %v5270_v17 = vld [vmem:[%s6502_s7 + $0x30] sm:$0xff]  }
 0x246   : > { %4802 = vmatprep.subr.bf16.mxu0 %v5356_v1  ;;  %4852 = vmatprep.subr.bf16.mxu1 %v5356_v1 }
 0x247   : > { %4806 = vmatprep.mubr.msk.bf16.mxu0 %vm5357_vm0, %v5356_v1  ;;  %4856 = vmatprep.mubr.msk.bf16.mxu1 %vm5357_vm0, %v5356_v1 }
 0x249   : > { %4803 = vmatpush3.bf16.msra.mxu0 %v5241_v20  ;;  %4853 = vmatpush3.bf16.msra.mxu1 %v5242_v21  ;;  %v5272_v20 = vld [vmem:[%s6504_s9] sm:$0xff]   ;;  %v5273_v21 = vld [vmem:[%s6504_s9 + $0x8] sm:$0xff]  }
 0x24a   : > { %4804 = vmatprep.subr.bf16.mxu0 %v5356_v1  ;;  %4854 = vmatprep.subr.bf16.mxu1 %v5356_v1 }
 0x24d   : > { %4805 = vmatpush3.bf16.msra.mxu0 %v2616_v24  ;;  %4855 = vmatpush3.bf16.msra.mxu1 %v2954_v26 }
 0x24e   : > { %4810 = vmatprep.subr.bf16.mxu0 %v5356_v1  ;;  %4860 = vmatprep.subr.bf16.mxu1 %v5356_v1 }
 0x250   : > { %4807 = vmatmul.mubr.msk.bf16.vlgmr.msra.gmra.mrb[8].mxu0 %vm2550_vm3, %v6218_v13  ;;  %4857 = vmatmul.mubr.msk.bf16.vlgmr.msra.gmra.mrb[8].mxu1 %vm2550_vm3, %v6218_v13 }
 0x251   : > { %4811 = vmatpush3.bf16.msra.mxu0 %v5245_v27  ;;  %4861 = vmatpush3.bf16.msra.mxu1 %v5246_v28 }
 0x252   : > { %4812 = vmatprep.subr.bf16.mxu0 %v5356_v1  ;;  %4862 = vmatprep.subr.bf16.mxu1 %v5356_v1 }
 0x253   : > { %4816 = vmatprep.mubr.msk.bf16.mxu0 %vm5357_vm0, %v5356_v1  ;;  %4866 = vmatprep.mubr.msk.bf16.mxu1 %vm5357_vm0, %v5356_v1 }
 0x255   : > { %4813 = vmatpush3.bf16.msra.mxu0 %v5247_v29  ;;  %4863 = vmatpush3.bf16.msra.mxu1 %v5248_v30 }
 0x256   : > { %4814 = vmatprep.subr.bf16.mxu0 %v5356_v1  ;;  %4864 = vmatprep.subr.bf16.mxu1 %v5356_v1 }
 0x259   : > { %4815 = vmatpush3.bf16.msra.mxu0 %v2685_v33  ;;  %4865 = vmatpush3.bf16.msra.mxu1 %v3018_v34 }
 0x25a   : > { %4820 = vmatprep.subr.bf16.mxu0 %v5356_v1  ;;  %4870 = vmatprep.subr.bf16.mxu1 %v5356_v1 }
 0x25c   : > { %4817 = vmatmul.mubr.msk.bf16.vlgmr.msra.gmra.mrb[8].mxu0 %vm2550_vm3, %v2665_v37  ;;  %4867 = vmatmul.mubr.msk.bf16.vlgmr.msra.gmra.mrb[8].mxu1 %vm2550_vm3, %v2665_v37  ;;  %v5276_v37 = vld [vmem:[%s6504_s9 + $0x20] sm:$0xff]  }
 0x25d   : > { %4821 = vmatpush3.bf16.msra.mxu0 %v5251_v35  ;;  %4871 = vmatpush3.bf16.msra.mxu1 %v5252_v36  ;;  %v5274_v35 = vld [vmem:[%s6504_s9 + $0x10] sm:$0xff]   ;;  %v5275_v36 = vld [vmem:[%s6504_s9 + $0x18] sm:$0xff]  }
 0x25e   : > { %4822 = vmatprep.subr.bf16.mxu0 %v5356_v1  ;;  %4872 = vmatprep.subr.bf16.mxu1 %v5356_v1 }
 0x25f   : > { %4826 = vmatprep.mubr.msk.bf16.mxu0 %vm5357_vm0, %v5356_v1  ;;  %4876 = vmatprep.mubr.msk.bf16.mxu1 %vm5357_vm0, %v5356_v1 }
 0x261   : > { %4823 = vmatpush3.bf16.msra.mxu0 %v5253_v38  ;;  %4873 = vmatpush3.bf16.msra.mxu1 %v5254_v39  ;;  %v5277_v38 = vld [vmem:[%s6504_s9 + $0x28] sm:$0xff]   ;;  %v5278_v39 = vld [vmem:[%s6504_s9 + $0x30] sm:$0xff]  }
 0x262   : > { %4824 = vmatprep.subr.bf16.mxu0 %v5356_v1  ;;  %4874 = vmatprep.subr.bf16.mxu1 %v5356_v1 }
 0x265   : > { %4825 = vmatpush3.bf16.msra.mxu0 %v2756_v42  ;;  %4875 = vmatpush3.bf16.msra.mxu1 %v3083_v43 }
 0x266   : > { %4830 = vmatprep.subr.bf16.mxu0 %v5356_v1  ;;  %4880 = vmatprep.subr.bf16.mxu1 %v5356_v1 }
 0x268   : > { %4827 = vmatmul.mubr.msk.bf16.vlgmr.msra.gmra.mrb[8].mxu0 %vm2550_vm3, %v2736_v48  ;;  %4877 = vmatmul.mubr.msk.bf16.vlgmr.msra.gmra.mrb[8].mxu1 %vm2550_vm3, %v2736_v48 }
 0x269   : > { %4831 = vmatpush3.bf16.msra.mxu0 %v5257_v46  ;;  %4881 = vmatpush3.bf16.msra.mxu1 %v5258_v47 }
 0x26a   : > { %4832 = vmatprep.subr.bf16.mxu0 %v5356_v1  ;;  %4882 = vmatprep.subr.bf16.mxu1 %v5356_v1 }
 0x26b   : > { %4836 = vmatprep.mubr.msk.bf16.mxu0 %vm5357_vm0, %v5356_v1  ;;  %4886 = vmatprep.mubr.msk.bf16.mxu1 %vm5357_vm0, %v5356_v1 }
 0x26d   : > { %4833 = vmatpush3.bf16.msra.mxu0 %v5259_v49  ;;  %4883 = vmatpush3.bf16.msra.mxu1 %v5260_v50 }
 0x26e   : > { %4834 = vmatprep.subr.bf16.mxu0 %v5356_v1  ;;  %4884 = vmatprep.subr.bf16.mxu1 %v5356_v1 }
 0x271   : > { %4835 = vmatpush3.bf16.msra.mxu0 %v2825_v25  ;;  %4885 = vmatpush3.bf16.msra.mxu1 %v3148_v54  ;;  %v3483_v25 = vand.u32 127, %v3482_v53  ;;  %v3393_v54 = vld [vmem:[%s6505_s10] sm:$0x1] }
 0x272   : > { %4890 = vmatprep.subr.bf16.mxu0 %v5356_v1  ;;  %4896 = vmatprep.subr.bf16.mxu1 %v5356_v1 }
 0x273   : > { %vm3484_vm8 = vcmp.lt.s32.totalorder %v3483_v25, 3 }
 0x274   : > { %4837 = vmatmul.mubr.msk.bf16.vlgmr.msra.gmra.mrb[8].mxu0 %vm2550_vm3, %v2805_v55  ;;  %4887 = vmatmul.mubr.msk.bf16.vlgmr.msra.gmra.mrb[8].mxu1 %vm2550_vm3, %v2805_v55 }
 0x275   : > { %4892 = vmatprep.mubr.msk.bf16.mxu0 %vm5357_vm0, %v5356_v1  ;;  %4912 = vmatprep.mubr.msk.bf16.mxu1 %vm5357_vm0, %v5356_v1 }
 0x276   : > { %4891 = vmatpush3.bf16.msra.mxu0 %v5263_v56  ;;  %4897 = vmatpush3.bf16.msra.mxu1 %v5264_v57 }
 0x277   : > { %4916 = vmatprep.subr.bf16.mxu0 %v5356_v1  ;;  %4898 = vmatprep.subr.bf16.mxu1 %v5356_v1 }
 0x27a   : > { %4899 = vmatpush3.bf16.msra.mxu1 %v5265_v58 }
 0x27b   : > { %4900 = vmatprep.subr.bf16.mxu1 %v5356_v1 }
 0x27e   : > { %4901 = vmatpush3.bf16.msra.mxu1 %v5266_v52 }
 0x27f   : > { %4902 = vmatprep.subr.bf16.mxu1 %v5356_v1 }
 0x282   : > { %4903 = vmatpush3.bf16.msra.mxu1 %v5267_v14 }
 0x283   : > { %4904 = vmatprep.subr.bf16.mxu1 %v5356_v1 }
 0x286   : > { %4905 = vmatpush3.bf16.msra.mxu1 %v5268_v15 }
 0x287   : > { %4906 = vmatprep.subr.bf16.mxu1 %v5356_v1 }
 0x28a   : > { %4907 = vmatpush3.bf16.msra.mxu1 %v5269_v16 }
 0x28b   : > { %4908 = vmatprep.subr.bf16.mxu1 %v5356_v1 }
 0x28e   : > { %4909 = vmatpush3.bf16.msra.mxu1 %v5270_v17 }
 0x28f   : > { %4910 = vmatprep.subr.bf16.mxu1 %v5356_v1 }
 0x292   : > { %4911 = vmatpush3.bf16.msra.mxu1 %v5271_v19 }
 0x347   : > { %v2861_v59 = vpop.f32.mrb[8].mxu0  ;;  %v3184_v60 = vpop.f32.mrb[8].mxu1 }
 0x348   : > { %v3191_v61 = vmax.f32 %v2861_v59, %v3184_v60  ;;  %v4838_v18 = vpop.f32.mrb[9].mxu0  ;;  %v4888_v62 = vpop.f32.mrb[9].mxu1 }
 0x349   : > { %v2864_v63 = vpop.f32.mrb[10].mxu0  ;;  %v3187_v0 = vpop.f32.mrb[10].mxu1 }
 0x34a   : > { %v3193_v2 = vrot.slane %v3191_v61, 1  ;;  %v4839_v3 = vpop.f32.mrb[11].mxu0  ;;  %v4889_v4 = vpop.f32.mrb[11].mxu1 }
 0x34c   : > { %v3195_v6 = vmax.f32 %v3191_v61, %v3193_v2 }
 0x34e   : > { %v3197_v7 = vadd.f32 %v3196_v5, %v3195_v6 }
 0x350   : > { %v3199_v8 = vmin.f32 %v3197_v7, 0.0  ;;  %vm3198_vm4 = vcmp.gt.f32.partialorder %v3197_v7, 0.0 }
 0x352   : > { %v3200_v9 = vmul.f32 1.442695, %v3199_v8 }
 0x354   : > { %5282 = vpow2.f32 %v3200_v9 }
 0x35e   : > { %v5283_v10 = vpop.eup %5282 }
 0x35f   : > { %v4126_v11 = vadd.f32 -1.0, %v5283_v10 }
 0x361   : > { %v3203_v12 = vsel %vm3198_vm4, %v3197_v7, %v4126_v11 }
 0x362   : > { %v3204_v13 = vpack.c.bf16 %v3203_v12, %v3203_v12 }
 0x364   : > { %4893 = vmatmul.mubr.msk.bf16.vlgmr.msra.gmra.mrb[12].mxu0 %vm3214_vm5, %v3204_v13 }
 0x365   : > { %4932 = vmatprep.mubr.msk.bf16.mxu0 %vm5357_vm0, %v5356_v1  ;;  %4917 = vmatpush3.bf16.msra.mxu0 %v5272_v20 }
 0x366   : > { %4918 = vmatprep.subr.bf16.mxu0 %v5356_v1 }
 0x369   : > { %4919 = vmatpush3.bf16.msra.mxu0 %v5273_v21 }
 0x36a   : > { %4920 = vmatprep.subr.bf16.mxu0 %v5356_v1 }
 0x36d   : > { %4921 = vmatpush3.bf16.msra.mxu0 %v5274_v35 }
 0x36e   : > { %4922 = vmatprep.subr.bf16.mxu0 %v5356_v1 }
 0x371   : > { %4923 = vmatpush3.bf16.msra.mxu0 %v5275_v36 }
 0x372   : > { %4924 = vmatprep.subr.bf16.mxu0 %v5356_v1 }
 0x375   : > { %4925 = vmatpush3.bf16.msra.mxu0 %v5276_v37 }
 0x376   : > { %4926 = vmatprep.subr.bf16.mxu0 %v5356_v1 }
 0x379   : > { %4927 = vmatpush3.bf16.msra.mxu0 %v5277_v38 }
 0x37a   : > { %4928 = vmatprep.subr.bf16.mxu0 %v5356_v1 }
 0x37d   : > { %4929 = vmatpush3.bf16.msra.mxu0 %v5278_v39 }
 0x37e   : > { %4930 = vmatprep.subr.bf16.mxu0 %v5356_v1 }
 0x381   : > { %4931 = vmatpush3.bf16.msra.mxu0 %v5279_v40 }
 0x437   : > { %v3252_v23 = vpop.f32.mrb[12].mxu0 }
 0x438   : > { %v3253_v24 = vadd.f32 %v3252_v23, %v3207_v22  ;;  %v4894_v26 = vpop.f32.mrb[13].mxu0 }
 0x439   : > { %v3255_v27 = vpop.f32.mrb[14].mxu0 }
 0x43a   : > { %v3259_v28 = vmin.f32 %v3253_v24, 0.0  ;;  %v4895_v29 = vpop.f32.mrb[15].mxu0  ;;  %vm3258_vm6 = vcmp.gt.f32.partialorder %v3253_v24, 0.0 }
 0x43c   : > { %v3260_v30 = vmul.f32 1.442695, %v3259_v28 }
 0x43e   : > { %5284 = vpow2.f32 %v3260_v30 }
 0x448   : > { %v5285_v31 = vpop.eup %5284 }
 0x449   : > { %v4129_v32 = vadd.f32 -1.0, %v5285_v31 }
 0x44b   : > { %v3263_v33 = vsel %vm3258_vm6, %v3253_v24, %v4129_v32 }
 0x44c   : > { %v3264_v34 = vpack.c.bf16 %v3263_v33, %v3263_v33 }
 0x44e   : > { %4913 = vmatmul.mubr.bf16.vlgmr.msra.gmra.mrb[12].mxu1 %v3264_v34 }
 0x521   : > { %v3364_v42 = vpop.f32.mrb[12].mxu1 }
 0x522   : > { %v3365_v43 = vadd.f32 %v3364_v42, %v3281_v41  ;;  %v4914_v44 = vpop.f32.mrb[13].mxu1 }
 0x523   : > { %v3367_v45 = vpop.f32.mrb[14].mxu1 }
 0x524   : > { %v3371_v46 = vmin.f32 %v3365_v43, 0.0  ;;  %v4915_v47 = vpop.f32.mrb[15].mxu1  ;;  %vm3370_vm7 = vcmp.gt.f32.partialorder %v3365_v43, 0.0 }
 0x526   : > { %v3372_v48 = vmul.f32 1.442695, %v3371_v46 }
 0x528   : > { %5286 = vpow2.f32 %v3372_v48 }
 0x532   : > { %v5287_v49 = vpop.eup %5286 }
 0x533   : > { %v4138_v50 = vadd.f32 -1.0, %v5287_v49 }
 0x535   : > { %v3375_v1 = vsel %vm3370_vm7, %v3365_v43, %v4138_v50 }
 0x536   : > { %v3376_v51 = vpack.c.bf16 %v3375_v1, %v3375_v1 }
 0x538   : > { %4933 = vmatmul.mubr.bf16.vlgmr.msra.gmra.mrb[16].mxu0 %v3376_v51 }
 0x60b   : > { %v3476_v55 = vpop.f32.mrb[16].mxu0 }
 0x60c   : > { %v3477_v56 = vadd.f32 %v3476_v55, %v3393_v54  ;;  %v4934_v57 = vpop.f32.mrb[17].mxu0 }
 0x60d   : > { %v3479_v58 = vpop.f32.mrb[18].mxu0 }
 0x60e   : > { %v4935_v59 = vpop.f32.mrb[19].mxu0  ;;  %v3485_v60 = vsel %vm3484_vm8, %v3477_v56, -1e+30 }
 0x60f   : > { %v3487_v61 = vsel %vm3486_vm9, %v3485_v60, -inf }
 0x610   : > { %3488 = vmax.xlane.f32.xlu0 %v3487_v61 }
 0x69d   : > { %v3489_v18 = vpop.xlane.xlu0 %3488 }
 0x69e   : > { %v3490_v62 = vsub.f32 %v3485_v60, %v3489_v18 }
 0x6a0   : > { %v3491_v63 = vmul.f32 1.442695, %v3490_v62 }
 0x6a2   : > { %5288 = vpow2.f32 %v3491_v63 }
 0x6ac   : > { %v5289_v0 = vpop.eup %5288 }
 0x6ad   : > { %v3493_v2 = vsel %vm3486_vm9, %v5289_v0, 0.0 }
 0x6ae   : > { %3494 = vadd.xlane.f32.xlu0 %v3493_v2 }
 0x73b   : > { %v3495_v3 = vpop.xlane.xlu0 %3494 }
 0x73c   : > { %5290 = vrcp.f32 %v3495_v3 }
 0x746   : > { %v5291_v4 = vpop.eup %5290 }
 0x747   : > { %v3497_v5 = vmul.f32 %v5291_v4, %v3495_v3 }
 0x749   : > { %v3498_v6 = vsub.f32 2.0, %v3497_v5 }
 0x74b   : > { %v3499_v7 = vmul.f32 %v5291_v4, %v3498_v6 }
 0x74d   : > { %v3500_v8 = vmul.f32 %v5289_v0, %v3499_v7 }
 0x74f   : > { %3501 = vst [vmem:[%s376_s16] sm:$0x1] %v3500_v8 }
 0x750   : > { %5305 = shalt.err (!%p5302_p3)
}
 0x751   : > { %s5306_s13 = scalar_lea.hbm %s6453_s25, 16  ;;  %s5310_s15 = scalar_lea.hbm %s6506_s11, 32 }
 0x752   : > { %p5307_p4 = scmp.ne.s32.totalorder %s6453_s25, %s5306_s13  ;;  %p5311_p9 = scmp.lt.u32.totalorder %s6453_s25, %s6506_s11 }
 0x753   : > { %p5312_p10 = scmp.lt.u32.totalorder %s5310_s15, %s5306_s13  ;;  %p5314_p12 = scmp.lt.u32.totalorder %s5306_s13, %s6453_s25 }
 0x754   : > { %p5308_p7 = pnand %p5307_p4, %p5457_p5 }
 0x755   : > { %p5313_p11 = por %p5312_p10, %p5311_p9 }
 0x756   : > { %p5309_p8 = pneg %p5308_p7 }
 0x757   : > { %p5315_p13 = por %p5314_p12, %p5313_p11 }
 0x759   : > { %p5316_p0 = pnand %p5315_p13, %p5309_p8 }
 0x75b   : > { %5319 = shalt.err (!%p5316_p0)
}
 0x75c   : > { %5032 = dma.vmem_to_hbm [thread:$0]  (%p5457_p5), %s6455_s22, 16, %s6453_s25, %s3503_s30  }
 0x75d PF: > { %p5038_p1 = scmp.ge.s32.totalorder %s5354_s20, 2  ;;  %s3527_s0 = sand.u32 1, %s5342_s17  }
 0x75e   : > { %s3528_s12 = scalar_lea.sflag [#allocation3], %s3527_s0 }
 0x75f   : > { %p5035_p2 = pnand %p5038_p1, %p5461_p6 }
 0x761   : > { %5337 = dma.done.wait (!%p5035_p2), %s3528_s12, 16  }
 0x762   : > { %5339 = vsyncadd (!%p5035_p2), %s3528_s12, 4294967280  ;;  %p21_p3 = scmp.ge.s32.totalorder %s5444_s23, 4   ;;  %s6511_s17 = smov %s5346_s18 }
 0x763   : > { %s6512_s18 = smov %s5350_s19  ;;  %s6513_s19 = smov %s5455_s26 }
 0x764   : > { %s6514_s20 = smov %s5444_s23  ;;  %23 = sbr.rel (!%p21_p3) target bundleno = 5 (0x5), region = 127 }
 0x76b   :  { %3532 = vsyncpa [#allocation3], 1 }
 0x76c   :  { %3534 = vsyncpa [#allocation3 + $0x1], 1 }

</bundles_post_ra>
